<compile_context>
chip_gen: v7x
topology: tpu7x:2x2x1
jax: 0.10.0
libtpu: 0.0.40
codegen_flags: <defaults>
</compile_context>

<pallas_src>
import jax
import jax.numpy as jnp
from jax import lax
from jax.experimental import pallas as pl
from jax.experimental.pallas import tpu as pltpu

# --- NAS-Bench-201 controller hyper-parameters (from the module __init__) ----
LSTM_SIZE = 32          # lstm_size
NUM_OPS = 5             # len(op_names) for NAS-Bench-201
NUM_OPS_PAD = 8         # sublane-padded ops axis used inside the kernel
NUM_EDGE = 6            # len(edge2index) for max_nodes=4  ->  C(4,2) = 6
TANH_CONSTANT = 2.5
TEMPERATURE = 5.0
NEG_BIG = -1e30         # "-inf" for padded logit rows (finite -> no NaNs)

# f32 constant-slab row layout (lanes = 4*H = 128)
ROW_E0 = 0        # rows 0-7  : e0 = embd @ W_ih0 (gate-scaled), rows 5-7 zero
ROW_WPRED = 8     # rows 8-15 : w_pred^T / TEMPERATURE at lanes 0-31
ROW_GUM = 16      # rows 16-23: gumbel^T (ops x edges) at lanes 0-5
ROW_BPRED = 24    # rows 24-31: b_pred^T / TEMPERATURE at lane 0
ROW_XC0 = 32      # row 32    : input_vars @ W_ih0 (gate-scaled)
ROW_B0 = 33       # row 33    : b_ih0 + b_hh0 (gate-scaled)
ROW_B1 = 34       # row 34    : b_ih1 + b_hh1 (gate-scaled)
FSLAB_ROWS = 40   # padded to a multiple of 8


def controller_kernel(wmat_ref, fslab_ref, out_ref):
    H, P, E = LSTM_SIZE, NUM_OPS_PAD, NUM_EDGE
    G = 4 * H

    # ---- hoisted loads: everything stays in vregs for the whole rollout -----
    wih1 = wmat_ref[0:H, :]                 # (32,128) bf16
    whh1 = wmat_ref[H:2 * H, :]             # (32,128) bf16
    whh0 = wmat_ref[2 * H:3 * H, :]         # (32,128) bf16

    e0 = fslab_ref[ROW_E0:ROW_E0 + P, :]                    # (8,128)
    wpredT = fslab_ref[ROW_WPRED:ROW_WPRED + P, 0:H]        # (8,32)  (1/T folded)
    gumT = fslab_ref[ROW_GUM:ROW_GUM + P, :]                # (8,128), lanes 0-5 real
    bpredT = fslab_ref[ROW_BPRED:ROW_BPRED + P, 0:1]        # (8,1)   (1/T folded)
    xc0 = fslab_ref[ROW_XC0:ROW_XC0 + 1, :]                 # (1,128)
    b0 = fslab_ref[ROW_B0:ROW_B0 + 1, :]                    # (1,128)
    b1 = fslab_ref[ROW_B1:ROW_B1 + 1, :]                    # (1,128)

    rowP_g = lax.broadcasted_iota(jnp.int32, (P, G), 0)     # op-row iota (e0 select)
    rowP_1 = lax.broadcasted_iota(jnp.int32, (P, 1), 0)     # op-row iota (column form)
    colE_p = lax.broadcasted_iota(jnp.int32, (P, P), 1)     # edge-column iota
    laneP = lax.broadcasted_iota(jnp.int32, (1, P), 1)      # edge-lane iota
    pad_col = jnp.where(rowP_1 < NUM_OPS, 0.0, NEG_BIG)     # (8,1), -inf on padded ops

    def cell(gates, c):
        # i/f/o columns were pre-scaled by 0.5 in the wrapper, so a single tanh
        # over the whole (1,128) gate vector yields sigmoid(a)=0.5*(tanh(a/2)+1)
        # on i/f/o and tanh(g) on g.
        t = jnp.tanh(gates)
        i = 0.5 * (t[:, 0 * H:1 * H] + 1.0)
        f = 0.5 * (t[:, 1 * H:2 * H] + 1.0)
        g = t[:, 2 * H:3 * H]
        o = 0.5 * (t[:, 3 * H:4 * H] + 1.0)
        c_new = f * c + i * g
        return o * jnp.tanh(c_new), c_new

    c0 = jnp.zeros((1, H), jnp.float32)
    c1 = jnp.zeros((1, H), jnp.float32)
    hh0_next = jnp.zeros((1, G), jnp.float32)   # h0 @ W_hh0, computed one edge ahead
    hh1_next = jnp.zeros((1, G), jnp.float32)   # h1 @ W_hh1, computed one edge ahead
    op_idx = jnp.zeros((1, 1), jnp.int32)

    logitsT = jnp.zeros((P, P), jnp.float32)    # (ops x edges) logits buffer
    actions = jnp.zeros((1, P), jnp.int32)

    # static (Python) loop over the 6 edges; the rollout is autoregressive.
    for iedge in range(E):
        # ---- layer-0 gates: one-hot row-select of e0 (no MXU on this path) ---
        if iedge == 0:
            gates0 = xc0 + b0                    # h0 == c0 == 0 at the first step
        else:
            e_row = jnp.sum(jnp.where(rowP_g == op_idx, e0, 0.0),
                            axis=0, keepdims=True)          # (1,128)
            gates0 = e_row + hh0_next + b0
        h0, c0 = cell(gates0, c0)

        h0b = h0.astype(jnp.bfloat16)
        if iedge + 1 < E:
            # off-critical-path: next edge's layer-0 hidden term (overlaps
            # with this edge's head / argmax work).
            hh0_next = jnp.dot(h0b, whh0, preferred_element_type=jnp.float32)

        # ---- layer-1 gates: the ONLY dependent MXU dot on the per-edge chain -
        gates1 = jnp.dot(h0b, wih1, preferred_element_type=jnp.float32) + hh1_next + b1
        h1, c1 = cell(gates1, c1)

        if iedge + 1 < E:
            # off-critical-path: next edge's layer-1 hidden term.
            hh1_next = jnp.dot(h1.astype(jnp.bfloat16), whh1,
                               preferred_element_type=jnp.float32)

        # ---- prediction head off the MXU: VPU mul + 32-lane reduce -----------
        lin = jnp.sum(h1 * wpredT, axis=1, keepdims=True) + bpredT   # (8,1)
        logits_col = TANH_CONSTANT * jnp.tanh(lin) + pad_col         # (8,1)

        # buffer logits; softmax / log-prob / entropy are batched after the loop
        logitsT = jnp.where(colE_p == iedge, logits_col, logitsT)

        # ---- Gumbel-max sampling: only the argmax stays on the serial chain --
        perturbed = logits_col + gumT[:, iedge:iedge + 1]            # (8,1)
        mx = jnp.max(perturbed, axis=0, keepdims=True)               # (1,1)
        op_f = jnp.min(jnp.where(perturbed >= mx,
                                 rowP_1.astype(jnp.float32), 1e9),
                       axis=0, keepdims=True)                        # first argmax
        op_idx = op_f.astype(jnp.int32)                              # (1,1)
        actions = jnp.where(laneP == iedge, op_idx, actions)

    # ---- post-loop: softmax / log-softmax / entropy for all edges at once ----
    m = jnp.max(logitsT, axis=0, keepdims=True)                      # (1,8)
    ex = jnp.exp(logitsT - m)                                        # pad ops -> exactly 0
    denom = jnp.sum(ex, axis=0, keepdims=True)                       # (1,8)
    probsT = ex / denom                                              # (8,8) ops x edges
    logpT = (logitsT - m) - jnp.log(denom)
    onehotT = (rowP_1 == actions).astype(jnp.float32)                # (8,8) sampled-op one-hots
    edge_mask = (laneP < E).astype(jnp.float32)                      # mask the 2 pad edges
    sum_logp = jnp.sum(jnp.sum(logpT * onehotT, axis=0, keepdims=True) * edge_mask,
                       axis=1, keepdims=True)                        # (1,1)
    sum_ent = -jnp.sum(jnp.sum(probsT * logpT, axis=0, keepdims=True) * edge_mask,
                       axis=1, keepdims=True)                        # (1,1)

    # ---- single lane-dense (8,128) output slab (one output DMA) --------------
    out_ref[...] = jnp.zeros((P, 128), jnp.float32)
    out_ref[:, 0:P] = probsT                                         # ops x edges
    out_ref[0:1, P:P + 1] = sum_logp
    out_ref[0:1, P + 1:P + 2] = sum_ent
    out_ref[1:2, P:2 * P] = actions.astype(jnp.float32)              # small ints, exact in f32


def pack_params(params, gumbel):
    """One-time (off critical path) weight packing for the kernel."""
    H, O, P, E = LSTM_SIZE, NUM_OPS, NUM_OPS_PAD, NUM_EDGE
    G = 4 * H
    f32 = jnp.float32

    # per-column gate scale: 0.5 on i/f/o lanes, 1.0 on g lanes (gate order i,f,g,o)
    gate_scale = jnp.concatenate(
        [jnp.full((1, H), 0.5, f32), jnp.full((1, H), 0.5, f32),
         jnp.ones((1, H), f32), jnp.full((1, H), 0.5, f32)], axis=1)        # (1, 4H)

    wih0 = params["wih0"].astype(f32) * gate_scale      # (H, 4H)
    whh0 = params["whh0"].astype(f32) * gate_scale
    b0 = params["b0"].astype(f32) * gate_scale
    wih1 = params["wih1"].astype(f32) * gate_scale
    whh1 = params["whh1"].astype(f32) * gate_scale
    b1 = params["b1"].astype(f32) * gate_scale

    # fold the embedding into layer-0's input weight:
    #   (onehot @ embd) @ Wih0 == onehot @ (embd @ Wih0)  -> row-select of e0
    e0 = params["embd"].astype(f32) @ wih0               # (O, 4H)
    xc0 = params["input_vars"].astype(f32) @ wih0        # (1, 4H), first-step input term

    # bf16 weight slab for the three per-edge dots (f32 accumulation in-kernel).
    wmat = jnp.concatenate([wih1, whh1, whh0], axis=0).astype(jnp.bfloat16)  # (96, 128)

    # f32 constant slab (everything the kernel needs besides the matmul weights)
    fslab = jnp.zeros((FSLAB_ROWS, G), f32)
    fslab = fslab.at[ROW_E0:ROW_E0 + O, :].set(e0)
    fslab = fslab.at[ROW_WPRED:ROW_WPRED + O, 0:H].set(
        params["wpred"].astype(f32).T / TEMPERATURE)                         # (O, H)
    fslab = fslab.at[ROW_GUM:ROW_GUM + O, 0:E].set(gumbel.astype(f32).T)     # (O, E)
    fslab = fslab.at[ROW_BPRED:ROW_BPRED + O, 0:1].set(
        params["bpred"].astype(f32).T / TEMPERATURE)                         # (O, 1)
    fslab = fslab.at[ROW_XC0:ROW_XC0 + 1, :].set(xc0)
    fslab = fslab.at[ROW_B0:ROW_B0 + 1, :].set(b0)
    fslab = fslab.at[ROW_B1:ROW_B1 + 1, :].set(b1)
    return wmat, fslab


def controller201_forward(params, gumbel):
    """Runs the full controller rollout in a single Pallas kernel call."""
    wmat, fslab = pack_params(params, gumbel)

    vmem = pl.BlockSpec(memory_space=pltpu.MemorySpace.VMEM)
    out = pl.pallas_call(
        controller_kernel,
        out_shape=jax.ShapeDtypeStruct((NUM_OPS_PAD, 128), jnp.float32),
        in_specs=[vmem, vmem],
        out_specs=vmem,
    )(wmat, fslab)

    P, E, O = NUM_OPS_PAD, NUM_EDGE, NUM_OPS
    probsT = out[0:P, 0:P]                                  # (ops, edges), padded
    x_probs = jnp.round(jnp.transpose(probsT)[:E, :O], 2)   # matches np.round(..., 2)
    sum_logp = out[0, P]
    sum_ent = out[0, P + 1]
    actions = out[1, P:P + E].astype(jnp.int32)
    # TODO(synk): nasbench.convert_structure(sampled_arch) has no tensor equivalent;
    # we return the raw sampled op indices instead.
    return x_probs, sum_logp, sum_ent, actions


def init_params(key):
    """Deterministic parameter init mirroring the module's shapes (uniform(-0.1, 0.1))."""
    H, O = LSTM_SIZE, NUM_OPS
    ks = jax.random.split(key, 10)
    u = lambda k, shp: jax.random.uniform(k, shp, jnp.float32, -0.1, 0.1)
    params = {
        "input_vars": u(ks[0], (1, H)),                 # (1, 1, H) squeezed
        "wih0": u(ks[1], (4 * H, H)).T,                 # stored transposed (H, 4H)
        "whh0": u(ks[2], (4 * H, H)).T,
        "b0":   u(ks[3], (1, 4 * H)),                   # b_ih + b_hh folded together
        "wih1": u(ks[4], (4 * H, H)).T,
        "whh1": u(ks[5], (4 * H, H)).T,
        "b1":   u(ks[6], (1, 4 * H)),
        "wpred": u(ks[7], (O, H)).T,                    # (H, O)
        "bpred": u(ks[8], (1, O)),
        "embd":  u(ks[9], (O, H)),
    }
    return params


if __name__ == "__main__":
    key = jax.random.PRNGKey(0)
    pkey, skey = jax.random.split(key)
    params = init_params(pkey)

    # Gumbel noise for the categorical sampling at each of the 6 edge decisions.
    uni = jax.random.uniform(skey, (NUM_EDGE, NUM_OPS), jnp.float32,
                             minval=1e-6, maxval=1.0 - 1e-6)
    gumbel = -jnp.log(-jnp.log(uni))

    x_probs, sum_logp, sum_ent, actions = jax.jit(controller201_forward)(params, gumbel)
    jax.block_until_ready((x_probs, sum_logp, sum_ent, actions))
    print("KERNEL_OK")
</pallas_src>

<mosaic_0001>
module attributes {stable_mosaic.version = 11 : i64} {
  func.func @controller_kernel(%arg0: memref<96x128xbf16, #tpu.memory_space<vmem>>, %arg1: memref<40x128xf32, #tpu.memory_space<vmem>>, %arg2: memref<8x128xf32, #tpu.memory_space<vmem>>) attributes {dimension_semantics = [], scalar_prefetch = 0 : i64, scratch_operands = 0 : i64, tpu.core_type = #tpu.core_type<tc>} {
    %c0 = arith.constant 0 : index
    %c0_0 = arith.constant 0 : index
    %0 = vector.load %arg0[%c0, %c0_0] : memref<96x128xbf16, #tpu.memory_space<vmem>>, vector<32x128xbf16>
    %c32 = arith.constant 32 : index
    %c0_1 = arith.constant 0 : index
    %1 = vector.load %arg0[%c32, %c0_1] : memref<96x128xbf16, #tpu.memory_space<vmem>>, vector<32x128xbf16>
    %c64 = arith.constant 64 : index
    %c0_2 = arith.constant 0 : index
    %2 = vector.load %arg0[%c64, %c0_2] : memref<96x128xbf16, #tpu.memory_space<vmem>>, vector<32x128xbf16>
    %c0_3 = arith.constant 0 : index
    %c0_4 = arith.constant 0 : index
    %3 = vector.load %arg1[%c0_3, %c0_4] : memref<40x128xf32, #tpu.memory_space<vmem>>, vector<8x128xf32>
    %c8 = arith.constant 8 : index
    %c0_5 = arith.constant 0 : index
    %4 = vector.load %arg1[%c8, %c0_5] : memref<40x128xf32, #tpu.memory_space<vmem>>, vector<8x32xf32>
    %c16 = arith.constant 16 : index
    %c0_6 = arith.constant 0 : index
    %5 = vector.load %arg1[%c16, %c0_6] : memref<40x128xf32, #tpu.memory_space<vmem>>, vector<8x128xf32>
    %c24 = arith.constant 24 : index
    %c0_7 = arith.constant 0 : index
    %6 = vector.load %arg1[%c24, %c0_7] : memref<40x128xf32, #tpu.memory_space<vmem>>, vector<8x1xf32>
    %c32_8 = arith.constant 32 : index
    %c0_9 = arith.constant 0 : index
    %7 = vector.load %arg1[%c32_8, %c0_9] : memref<40x128xf32, #tpu.memory_space<vmem>>, vector<1x128xf32>
    %c33 = arith.constant 33 : index
    %c0_10 = arith.constant 0 : index
    %8 = vector.load %arg1[%c33, %c0_10] : memref<40x128xf32, #tpu.memory_space<vmem>>, vector<1x128xf32>
    %c34 = arith.constant 34 : index
    %c0_11 = arith.constant 0 : index
    %9 = vector.load %arg1[%c34, %c0_11] : memref<40x128xf32, #tpu.memory_space<vmem>>, vector<1x128xf32>
    %10 = tpu.iota {dimensions = array<i32: 0>} : vector<8x128xi32>
    %11 = tpu.iota {dimensions = array<i32: 0>} : vector<8x1xi32>
    %12 = tpu.iota {dimensions = array<i32: 1>} : vector<8x8xi32>
    %13 = tpu.iota {dimensions = array<i32: 1>} : vector<1x8xi32>
    %c5_i32 = arith.constant 5 : i32
    %14 = vector.broadcast %c5_i32 : i32 to vector<8x1xi32>
    %15 = arith.cmpi slt, %11, %14 : vector<8x1xi32>
    %cst = arith.constant 0.000000e+00 : f32
    %cst_12 = arith.constant -1.000000e+30 : f32
    %16 = vector.broadcast %cst : f32 to vector<8x1xf32>
    %17 = vector.broadcast %cst_12 : f32 to vector<8x1xf32>
    %18 = arith.select %15, %16, %17 : vector<8x1xi1>, vector<8x1xf32>
    %cst_13 = arith.constant 0.000000e+00 : f32
    %19 = vector.broadcast %cst_13 : f32 to vector<1x32xf32>
    %cst_14 = arith.constant 0.000000e+00 : f32
    %20 = vector.broadcast %cst_14 : f32 to vector<1x32xf32>
    %cst_15 = arith.constant 0.000000e+00 : f32
    %21 = vector.broadcast %cst_15 : f32 to vector<1x128xf32>
    %cst_16 = arith.constant 0.000000e+00 : f32
    %22 = vector.broadcast %cst_16 : f32 to vector<8x8xf32>
    %c0_i32 = arith.constant 0 : i32
    %23 = vector.broadcast %c0_i32 : i32 to vector<1x8xi32>
    %24 = arith.addf %7, %8 : vector<1x128xf32>
    %25 = math.tanh %24 : vector<1x128xf32>
    %26 = vector.extract_strided_slice %25 {offsets = [0, 0], sizes = [1, 32], strides = [1, 1]} : vector<1x128xf32> to vector<1x32xf32>
    %cst_17 = arith.constant 1.000000e+00 : f32
    %27 = vector.broadcast %cst_17 : f32 to vector<1x32xf32>
    %28 = arith.addf %26, %27 : vector<1x32xf32>
    %cst_18 = arith.constant 5.000000e-01 : f32
    %29 = vector.broadcast %cst_18 : f32 to vector<1x32xf32>
    %30 = arith.mulf %29, %28 : vector<1x32xf32>
    %31 = vector.extract_strided_slice %25 {offsets = [0, 32], sizes = [1, 32], strides = [1, 1]} : vector<1x128xf32> to vector<1x32xf32>
    %cst_19 = arith.constant 1.000000e+00 : f32
    %32 = vector.broadcast %cst_19 : f32 to vector<1x32xf32>
    %33 = arith.addf %31, %32 : vector<1x32xf32>
    %cst_20 = arith.constant 5.000000e-01 : f32
    %34 = vector.broadcast %cst_20 : f32 to vector<1x32xf32>
    %35 = arith.mulf %34, %33 : vector<1x32xf32>
    %36 = vector.extract_strided_slice %25 {offsets = [0, 64], sizes = [1, 32], strides = [1, 1]} : vector<1x128xf32> to vector<1x32xf32>
    %37 = vector.extract_strided_slice %25 {offsets = [0, 96], sizes = [1, 32], strides = [1, 1]} : vector<1x128xf32> to vector<1x32xf32>
    %cst_21 = arith.constant 1.000000e+00 : f32
    %38 = vector.broadcast %cst_21 : f32 to vector<1x32xf32>
    %39 = arith.addf %37, %38 : vector<1x32xf32>
    %cst_22 = arith.constant 5.000000e-01 : f32
    %40 = vector.broadcast %cst_22 : f32 to vector<1x32xf32>
    %41 = arith.mulf %40, %39 : vector<1x32xf32>
    %42 = arith.mulf %35, %19 : vector<1x32xf32>
    %43 = arith.mulf %30, %36 : vector<1x32xf32>
    %44 = arith.addf %42, %43 : vector<1x32xf32>
    %45 = math.tanh %44 : vector<1x32xf32>
    %46 = arith.mulf %41, %45 : vector<1x32xf32>
    %47 = arith.truncf %46 : vector<1x32xf32> to vector<1x32xbf16>
    %cst_23 = arith.constant dense<0.000000e+00> : vector<1x128xf32>
    %48 = tpu.matmul %47, %2, %cst_23 {dimension_numbers = #tpu.dot_dimension_numbers<[1], [0], [0], [1], [0, 0, 1, 1], [], []>} : vector<1x32xbf16>, vector<32x128xbf16>, vector<1x128xf32> -> vector<1x128xf32>
    %cst_24 = arith.constant dense<0.000000e+00> : vector<1x128xf32>
    %49 = tpu.matmul %47, %0, %cst_24 {dimension_numbers = #tpu.dot_dimension_numbers<[1], [0], [0], [1], [0, 0, 1, 1], [], []>} : vector<1x32xbf16>, vector<32x128xbf16>, vector<1x128xf32> -> vector<1x128xf32>
    %50 = arith.addf %49, %21 : vector<1x128xf32>
    %51 = arith.addf %50, %9 : vector<1x128xf32>
    %52 = math.tanh %51 : vector<1x128xf32>
    %53 = vector.extract_strided_slice %52 {offsets = [0, 0], sizes = [1, 32], strides = [1, 1]} : vector<1x128xf32> to vector<1x32xf32>
    %cst_25 = arith.constant 1.000000e+00 : f32
    %54 = vector.broadcast %cst_25 : f32 to vector<1x32xf32>
    %55 = arith.addf %53, %54 : vector<1x32xf32>
    %cst_26 = arith.constant 5.000000e-01 : f32
    %56 = vector.broadcast %cst_26 : f32 to vector<1x32xf32>
    %57 = arith.mulf %56, %55 : vector<1x32xf32>
    %58 = vector.extract_strided_slice %52 {offsets = [0, 32], sizes = [1, 32], strides = [1, 1]} : vector<1x128xf32> to vector<1x32xf32>
    %cst_27 = arith.constant 1.000000e+00 : f32
    %59 = vector.broadcast %cst_27 : f32 to vector<1x32xf32>
    %60 = arith.addf %58, %59 : vector<1x32xf32>
    %cst_28 = arith.constant 5.000000e-01 : f32
    %61 = vector.broadcast %cst_28 : f32 to vector<1x32xf32>
    %62 = arith.mulf %61, %60 : vector<1x32xf32>
    %63 = vector.extract_strided_slice %52 {offsets = [0, 64], sizes = [1, 32], strides = [1, 1]} : vector<1x128xf32> to vector<1x32xf32>
    %64 = vector.extract_strided_slice %52 {offsets = [0, 96], sizes = [1, 32], strides = [1, 1]} : vector<1x128xf32> to vector<1x32xf32>
    %cst_29 = arith.constant 1.000000e+00 : f32
    %65 = vector.broadcast %cst_29 : f32 to vector<1x32xf32>
    %66 = arith.addf %64, %65 : vector<1x32xf32>
    %cst_30 = arith.constant 5.000000e-01 : f32
    %67 = vector.broadcast %cst_30 : f32 to vector<1x32xf32>
    %68 = arith.mulf %67, %66 : vector<1x32xf32>
    %69 = arith.mulf %62, %20 : vector<1x32xf32>
    %70 = arith.mulf %57, %63 : vector<1x32xf32>
    %71 = arith.addf %69, %70 : vector<1x32xf32>
    %72 = math.tanh %71 : vector<1x32xf32>
    %73 = arith.mulf %68, %72 : vector<1x32xf32>
    %74 = arith.truncf %73 : vector<1x32xf32> to vector<1x32xbf16>
    %cst_31 = arith.constant dense<0.000000e+00> : vector<1x128xf32>
    %75 = tpu.matmul %74, %1, %cst_31 {dimension_numbers = #tpu.dot_dimension_numbers<[1], [0], [0], [1], [0, 0, 1, 1], [], []>} : vector<1x32xbf16>, vector<32x128xbf16>, vector<1x128xf32> -> vector<1x128xf32>
    %76 = vector.broadcast %73 : vector<1x32xf32> to vector<8x32xf32>
    %77 = arith.mulf %76, %4 : vector<8x32xf32>
    %cst_32 = arith.constant dense<0.000000e+00> : vector<8xf32>
    %78 = vector.multi_reduction <add>, %77, %cst_32 [1] : vector<8x32xf32> to vector<8xf32>
    %79 = vector.shape_cast %78 : vector<8xf32> to vector<8x1xf32>
    %80 = arith.addf %79, %6 : vector<8x1xf32>
    %81 = math.tanh %80 : vector<8x1xf32>
    %cst_33 = arith.constant 2.500000e+00 : f32
    %82 = vector.broadcast %cst_33 : f32 to vector<8x1xf32>
    %83 = arith.mulf %82, %81 : vector<8x1xf32>
    %84 = arith.addf %83, %18 : vector<8x1xf32>
    %c0_i32_34 = arith.constant 0 : i32
    %85 = vector.broadcast %c0_i32_34 : i32 to vector<8x8xi32>
    %86 = arith.cmpi eq, %12, %85 : vector<8x8xi32>
    %87 = vector.shape_cast %84 : vector<8x1xf32> to vector<8x1xf32>
    %88 = vector.broadcast %87 : vector<8x1xf32> to vector<8x8xf32>
    %89 = arith.select %86, %88, %22 : vector<8x8xi1>, vector<8x8xf32>
    %90 = vector.extract_strided_slice %5 {offsets = [0, 0], sizes = [8, 1], strides = [1, 1]} : vector<8x128xf32> to vector<8x1xf32>
    %91 = arith.addf %84, %90 : vector<8x1xf32>
    %cst_35 = arith.constant dense<0xFF800000> : vector<1xf32>
    %92 = vector.multi_reduction <maximumf>, %91, %cst_35 [0] : vector<8x1xf32> to vector<1xf32>
    %93 = vector.shape_cast %92 : vector<1xf32> to vector<1x1xf32>
    %94 = vector.broadcast %93 : vector<1x1xf32> to vector<8x1xf32>
    %95 = arith.cmpf oge, %91, %94 : vector<8x1xf32>
    %96 = arith.sitofp %11 : vector<8x1xi32> to vector<8x1xf32>
    %cst_36 = arith.constant 1.000000e+09 : f32
    %97 = vector.broadcast %cst_36 : f32 to vector<8x1xf32>
    %98 = arith.select %95, %96, %97 : vector<8x1xi1>, vector<8x1xf32>
    %cst_37 = arith.constant dense<0x7F800000> : vector<1xf32>
    %99 = vector.multi_reduction <minimumf>, %98, %cst_37 [0] : vector<8x1xf32> to vector<1xf32>
    %100 = vector.shape_cast %99 : vector<1xf32> to vector<1x1xf32>
    %101 = arith.fptosi %100 : vector<1x1xf32> to vector<1x1xi32>
    %c0_i32_38 = arith.constant 0 : i32
    %102 = vector.broadcast %c0_i32_38 : i32 to vector<1x8xi32>
    %103 = arith.cmpi eq, %13, %102 : vector<1x8xi32>
    %104 = vector.shape_cast %101 : vector<1x1xi32> to vector<1x1xi32>
    %105 = vector.broadcast %104 : vector<1x1xi32> to vector<1x8xi32>
    %106 = arith.select %103, %105, %23 : vector<1x8xi1>, vector<1x8xi32>
    %107 = vector.broadcast %101 : vector<1x1xi32> to vector<8x128xi32>
    %108 = arith.cmpi eq, %10, %107 : vector<8x128xi32>
    %cst_39 = arith.constant 0.000000e+00 : f32
    %109 = vector.broadcast %cst_39 : f32 to vector<8x128xf32>
    %110 = arith.select %108, %3, %109 : vector<8x128xi1>, vector<8x128xf32>
    %cst_40 = arith.constant dense<0.000000e+00> : vector<128xf32>
    %111 = vector.multi_reduction <add>, %110, %cst_40 [0] : vector<8x128xf32> to vector<128xf32>
    %112 = vector.shape_cast %111 : vector<128xf32> to vector<1x128xf32>
    %113 = arith.addf %112, %48 : vector<1x128xf32>
    %114 = arith.addf %113, %8 : vector<1x128xf32>
    %115 = math.tanh %114 : vector<1x128xf32>
    %116 = vector.extract_strided_slice %115 {offsets = [0, 0], sizes = [1, 32], strides = [1, 1]} : vector<1x128xf32> to vector<1x32xf32>
    %cst_41 = arith.constant 1.000000e+00 : f32
    %117 = vector.broadcast %cst_41 : f32 to vector<1x32xf32>
    %118 = arith.addf %116, %117 : vector<1x32xf32>
    %cst_42 = arith.constant 5.000000e-01 : f32
    %119 = vector.broadcast %cst_42 : f32 to vector<1x32xf32>
    %120 = arith.mulf %119, %118 : vector<1x32xf32>
    %121 = vector.extract_strided_slice %115 {offsets = [0, 32], sizes = [1, 32], strides = [1, 1]} : vector<1x128xf32> to vector<1x32xf32>
    %cst_43 = arith.constant 1.000000e+00 : f32
    %122 = vector.broadcast %cst_43 : f32 to vector<1x32xf32>
    %123 = arith.addf %121, %122 : vector<1x32xf32>
    %cst_44 = arith.constant 5.000000e-01 : f32
    %124 = vector.broadcast %cst_44 : f32 to vector<1x32xf32>
    %125 = arith.mulf %124, %123 : vector<1x32xf32>
    %126 = vector.extract_strided_slice %115 {offsets = [0, 64], sizes = [1, 32], strides = [1, 1]} : vector<1x128xf32> to vector<1x32xf32>
    %127 = vector.extract_strided_slice %115 {offsets = [0, 96], sizes = [1, 32], strides = [1, 1]} : vector<1x128xf32> to vector<1x32xf32>
    %cst_45 = arith.constant 1.000000e+00 : f32
    %128 = vector.broadcast %cst_45 : f32 to vector<1x32xf32>
    %129 = arith.addf %127, %128 : vector<1x32xf32>
    %cst_46 = arith.constant 5.000000e-01 : f32
    %130 = vector.broadcast %cst_46 : f32 to vector<1x32xf32>
    %131 = arith.mulf %130, %129 : vector<1x32xf32>
    %132 = arith.mulf %125, %44 : vector<1x32xf32>
    %133 = arith.mulf %120, %126 : vector<1x32xf32>
    %134 = arith.addf %132, %133 : vector<1x32xf32>
    %135 = math.tanh %134 : vector<1x32xf32>
    %136 = arith.mulf %131, %135 : vector<1x32xf32>
    %137 = arith.truncf %136 : vector<1x32xf32> to vector<1x32xbf16>
    %cst_47 = arith.constant dense<0.000000e+00> : vector<1x128xf32>
    %138 = tpu.matmul %137, %2, %cst_47 {dimension_numbers = #tpu.dot_dimension_numbers<[1], [0], [0], [1], [0, 0, 1, 1], [], []>} : vector<1x32xbf16>, vector<32x128xbf16>, vector<1x128xf32> -> vector<1x128xf32>
    %cst_48 = arith.constant dense<0.000000e+00> : vector<1x128xf32>
    %139 = tpu.matmul %137, %0, %cst_48 {dimension_numbers = #tpu.dot_dimension_numbers<[1], [0], [0], [1], [0, 0, 1, 1], [], []>} : vector<1x32xbf16>, vector<32x128xbf16>, vector<1x128xf32> -> vector<1x128xf32>
    %140 = arith.addf %139, %75 : vector<1x128xf32>
    %141 = arith.addf %140, %9 : vector<1x128xf32>
    %142 = math.tanh %141 : vector<1x128xf32>
    %143 = vector.extract_strided_slice %142 {offsets = [0, 0], sizes = [1, 32], strides = [1, 1]} : vector<1x128xf32> to vector<1x32xf32>
    %cst_49 = arith.constant 1.000000e+00 : f32
    %144 = vector.broadcast %cst_49 : f32 to vector<1x32xf32>
    %145 = arith.addf %143, %144 : vector<1x32xf32>
    %cst_50 = arith.constant 5.000000e-01 : f32
    %146 = vector.broadcast %cst_50 : f32 to vector<1x32xf32>
    %147 = arith.mulf %146, %145 : vector<1x32xf32>
    %148 = vector.extract_strided_slice %142 {offsets = [0, 32], sizes = [1, 32], strides = [1, 1]} : vector<1x128xf32> to vector<1x32xf32>
    %cst_51 = arith.constant 1.000000e+00 : f32
    %149 = vector.broadcast %cst_51 : f32 to vector<1x32xf32>
    %150 = arith.addf %148, %149 : vector<1x32xf32>
    %cst_52 = arith.constant 5.000000e-01 : f32
    %151 = vector.broadcast %cst_52 : f32 to vector<1x32xf32>
    %152 = arith.mulf %151, %150 : vector<1x32xf32>
    %153 = vector.extract_strided_slice %142 {offsets = [0, 64], sizes = [1, 32], strides = [1, 1]} : vector<1x128xf32> to vector<1x32xf32>
    %154 = vector.extract_strided_slice %142 {offsets = [0, 96], sizes = [1, 32], strides = [1, 1]} : vector<1x128xf32> to vector<1x32xf32>
    %cst_53 = arith.constant 1.000000e+00 : f32
    %155 = vector.broadcast %cst_53 : f32 to vector<1x32xf32>
    %156 = arith.addf %154, %155 : vector<1x32xf32>
    %cst_54 = arith.constant 5.000000e-01 : f32
    %157 = vector.broadcast %cst_54 : f32 to vector<1x32xf32>
    %158 = arith.mulf %157, %156 : vector<1x32xf32>
    %159 = arith.mulf %152, %71 : vector<1x32xf32>
    %160 = arith.mulf %147, %153 : vector<1x32xf32>
    %161 = arith.addf %159, %160 : vector<1x32xf32>
    %162 = math.tanh %161 : vector<1x32xf32>
    %163 = arith.mulf %158, %162 : vector<1x32xf32>
    %164 = arith.truncf %163 : vector<1x32xf32> to vector<1x32xbf16>
    %cst_55 = arith.constant dense<0.000000e+00> : vector<1x128xf32>
    %165 = tpu.matmul %164, %1, %cst_55 {dimension_numbers = #tpu.dot_dimension_numbers<[1], [0], [0], [1], [0, 0, 1, 1], [], []>} : vector<1x32xbf16>, vector<32x128xbf16>, vector<1x128xf32> -> vector<1x128xf32>
    %166 = vector.broadcast %163 : vector<1x32xf32> to vector<8x32xf32>
    %167 = arith.mulf %166, %4 : vector<8x32xf32>
    %cst_56 = arith.constant dense<0.000000e+00> : vector<8xf32>
    %168 = vector.multi_reduction <add>, %167, %cst_56 [1] : vector<8x32xf32> to vector<8xf32>
    %169 = vector.shape_cast %168 : vector<8xf32> to vector<8x1xf32>
    %170 = arith.addf %169, %6 : vector<8x1xf32>
    %171 = math.tanh %170 : vector<8x1xf32>
    %cst_57 = arith.constant 2.500000e+00 : f32
    %172 = vector.broadcast %cst_57 : f32 to vector<8x1xf32>
    %173 = arith.mulf %172, %171 : vector<8x1xf32>
    %174 = arith.addf %173, %18 : vector<8x1xf32>
    %c1_i32 = arith.constant 1 : i32
    %175 = vector.broadcast %c1_i32 : i32 to vector<8x8xi32>
    %176 = arith.cmpi eq, %12, %175 : vector<8x8xi32>
    %177 = vector.shape_cast %174 : vector<8x1xf32> to vector<8x1xf32>
    %178 = vector.broadcast %177 : vector<8x1xf32> to vector<8x8xf32>
    %179 = arith.select %176, %178, %89 : vector<8x8xi1>, vector<8x8xf32>
    %180 = vector.extract_strided_slice %5 {offsets = [0, 1], sizes = [8, 1], strides = [1, 1]} : vector<8x128xf32> to vector<8x1xf32>
    %181 = arith.addf %174, %180 : vector<8x1xf32>
    %cst_58 = arith.constant dense<0xFF800000> : vector<1xf32>
    %182 = vector.multi_reduction <maximumf>, %181, %cst_58 [0] : vector<8x1xf32> to vector<1xf32>
    %183 = vector.shape_cast %182 : vector<1xf32> to vector<1x1xf32>
    %184 = vector.broadcast %183 : vector<1x1xf32> to vector<8x1xf32>
    %185 = arith.cmpf oge, %181, %184 : vector<8x1xf32>
    %186 = arith.sitofp %11 : vector<8x1xi32> to vector<8x1xf32>
    %cst_59 = arith.constant 1.000000e+09 : f32
    %187 = vector.broadcast %cst_59 : f32 to vector<8x1xf32>
    %188 = arith.select %185, %186, %187 : vector<8x1xi1>, vector<8x1xf32>
    %cst_60 = arith.constant dense<0x7F800000> : vector<1xf32>
    %189 = vector.multi_reduction <minimumf>, %188, %cst_60 [0] : vector<8x1xf32> to vector<1xf32>
    %190 = vector.shape_cast %189 : vector<1xf32> to vector<1x1xf32>
    %191 = arith.fptosi %190 : vector<1x1xf32> to vector<1x1xi32>
    %c1_i32_61 = arith.constant 1 : i32
    %192 = vector.broadcast %c1_i32_61 : i32 to vector<1x8xi32>
    %193 = arith.cmpi eq, %13, %192 : vector<1x8xi32>
    %194 = vector.shape_cast %191 : vector<1x1xi32> to vector<1x1xi32>
    %195 = vector.broadcast %194 : vector<1x1xi32> to vector<1x8xi32>
    %196 = arith.select %193, %195, %106 : vector<1x8xi1>, vector<1x8xi32>
    %197 = vector.broadcast %191 : vector<1x1xi32> to vector<8x128xi32>
    %198 = arith.cmpi eq, %10, %197 : vector<8x128xi32>
    %cst_62 = arith.constant 0.000000e+00 : f32
    %199 = vector.broadcast %cst_62 : f32 to vector<8x128xf32>
    %200 = arith.select %198, %3, %199 : vector<8x128xi1>, vector<8x128xf32>
    %cst_63 = arith.constant dense<0.000000e+00> : vector<128xf32>
    %201 = vector.multi_reduction <add>, %200, %cst_63 [0] : vector<8x128xf32> to vector<128xf32>
    %202 = vector.shape_cast %201 : vector<128xf32> to vector<1x128xf32>
    %203 = arith.addf %202, %138 : vector<1x128xf32>
    %204 = arith.addf %203, %8 : vector<1x128xf32>
    %205 = math.tanh %204 : vector<1x128xf32>
    %206 = vector.extract_strided_slice %205 {offsets = [0, 0], sizes = [1, 32], strides = [1, 1]} : vector<1x128xf32> to vector<1x32xf32>
    %cst_64 = arith.constant 1.000000e+00 : f32
    %207 = vector.broadcast %cst_64 : f32 to vector<1x32xf32>
    %208 = arith.addf %206, %207 : vector<1x32xf32>
    %cst_65 = arith.constant 5.000000e-01 : f32
    %209 = vector.broadcast %cst_65 : f32 to vector<1x32xf32>
    %210 = arith.mulf %209, %208 : vector<1x32xf32>
    %211 = vector.extract_strided_slice %205 {offsets = [0, 32], sizes = [1, 32], strides = [1, 1]} : vector<1x128xf32> to vector<1x32xf32>
    %cst_66 = arith.constant 1.000000e+00 : f32
    %212 = vector.broadcast %cst_66 : f32 to vector<1x32xf32>
    %213 = arith.addf %211, %212 : vector<1x32xf32>
    %cst_67 = arith.constant 5.000000e-01 : f32
    %214 = vector.broadcast %cst_67 : f32 to vector<1x32xf32>
    %215 = arith.mulf %214, %213 : vector<1x32xf32>
    %216 = vector.extract_strided_slice %205 {offsets = [0, 64], sizes = [1, 32], strides = [1, 1]} : vector<1x128xf32> to vector<1x32xf32>
    %217 = vector.extract_strided_slice %205 {offsets = [0, 96], sizes = [1, 32], strides = [1, 1]} : vector<1x128xf32> to vector<1x32xf32>
    %cst_68 = arith.constant 1.000000e+00 : f32
    %218 = vector.broadcast %cst_68 : f32 to vector<1x32xf32>
    %219 = arith.addf %217, %218 : vector<1x32xf32>
    %cst_69 = arith.constant 5.000000e-01 : f32
    %220 = vector.broadcast %cst_69 : f32 to vector<1x32xf32>
    %221 = arith.mulf %220, %219 : vector<1x32xf32>
    %222 = arith.mulf %215, %134 : vector<1x32xf32>
    %223 = arith.mulf %210, %216 : vector<1x32xf32>
    %224 = arith.addf %222, %223 : vector<1x32xf32>
    %225 = math.tanh %224 : vector<1x32xf32>
    %226 = arith.mulf %221, %225 : vector<1x32xf32>
    %227 = arith.truncf %226 : vector<1x32xf32> to vector<1x32xbf16>
    %cst_70 = arith.constant dense<0.000000e+00> : vector<1x128xf32>
    %228 = tpu.matmul %227, %2, %cst_70 {dimension_numbers = #tpu.dot_dimension_numbers<[1], [0], [0], [1], [0, 0, 1, 1], [], []>} : vector<1x32xbf16>, vector<32x128xbf16>, vector<1x128xf32> -> vector<1x128xf32>
    %cst_71 = arith.constant dense<0.000000e+00> : vector<1x128xf32>
    %229 = tpu.matmul %227, %0, %cst_71 {dimension_numbers = #tpu.dot_dimension_numbers<[1], [0], [0], [1], [0, 0, 1, 1], [], []>} : vector<1x32xbf16>, vector<32x128xbf16>, vector<1x128xf32> -> vector<1x128xf32>
    %230 = arith.addf %229, %165 : vector<1x128xf32>
    %231 = arith.addf %230, %9 : vector<1x128xf32>
    %232 = math.tanh %231 : vector<1x128xf32>
    %233 = vector.extract_strided_slice %232 {offsets = [0, 0], sizes = [1, 32], strides = [1, 1]} : vector<1x128xf32> to vector<1x32xf32>
    %cst_72 = arith.constant 1.000000e+00 : f32
    %234 = vector.broadcast %cst_72 : f32 to vector<1x32xf32>
    %235 = arith.addf %233, %234 : vector<1x32xf32>
    %cst_73 = arith.constant 5.000000e-01 : f32
    %236 = vector.broadcast %cst_73 : f32 to vector<1x32xf32>
    %237 = arith.mulf %236, %235 : vector<1x32xf32>
    %238 = vector.extract_strided_slice %232 {offsets = [0, 32], sizes = [1, 32], strides = [1, 1]} : vector<1x128xf32> to vector<1x32xf32>
    %cst_74 = arith.constant 1.000000e+00 : f32
    %239 = vector.broadcast %cst_74 : f32 to vector<1x32xf32>
    %240 = arith.addf %238, %239 : vector<1x32xf32>
    %cst_75 = arith.constant 5.000000e-01 : f32
    %241 = vector.broadcast %cst_75 : f32 to vector<1x32xf32>
    %242 = arith.mulf %241, %240 : vector<1x32xf32>
    %243 = vector.extract_strided_slice %232 {offsets = [0, 64], sizes = [1, 32], strides = [1, 1]} : vector<1x128xf32> to vector<1x32xf32>
    %244 = vector.extract_strided_slice %232 {offsets = [0, 96], sizes = [1, 32], strides = [1, 1]} : vector<1x128xf32> to vector<1x32xf32>
    %cst_76 = arith.constant 1.000000e+00 : f32
    %245 = vector.broadcast %cst_76 : f32 to vector<1x32xf32>
    %246 = arith.addf %244, %245 : vector<1x32xf32>
    %cst_77 = arith.constant 5.000000e-01 : f32
    %247 = vector.broadcast %cst_77 : f32 to vector<1x32xf32>
    %248 = arith.mulf %247, %246 : vector<1x32xf32>
    %249 = arith.mulf %242, %161 : vector<1x32xf32>
    %250 = arith.mulf %237, %243 : vector<1x32xf32>
    %251 = arith.addf %249, %250 : vector<1x32xf32>
    %252 = math.tanh %251 : vector<1x32xf32>
    %253 = arith.mulf %248, %252 : vector<1x32xf32>
    %254 = arith.truncf %253 : vector<1x32xf32> to vector<1x32xbf16>
    %cst_78 = arith.constant dense<0.000000e+00> : vector<1x128xf32>
    %255 = tpu.matmul %254, %1, %cst_78 {dimension_numbers = #tpu.dot_dimension_numbers<[1], [0], [0], [1], [0, 0, 1, 1], [], []>} : vector<1x32xbf16>, vector<32x128xbf16>, vector<1x128xf32> -> vector<1x128xf32>
    %256 = vector.broadcast %253 : vector<1x32xf32> to vector<8x32xf32>
    %257 = arith.mulf %256, %4 : vector<8x32xf32>
    %cst_79 = arith.constant dense<0.000000e+00> : vector<8xf32>
    %258 = vector.multi_reduction <add>, %257, %cst_79 [1] : vector<8x32xf32> to vector<8xf32>
    %259 = vector.shape_cast %258 : vector<8xf32> to vector<8x1xf32>
    %260 = arith.addf %259, %6 : vector<8x1xf32>
    %261 = math.tanh %260 : vector<8x1xf32>
    %cst_80 = arith.constant 2.500000e+00 : f32
    %262 = vector.broadcast %cst_80 : f32 to vector<8x1xf32>
    %263 = arith.mulf %262, %261 : vector<8x1xf32>
    %264 = arith.addf %263, %18 : vector<8x1xf32>
    %c2_i32 = arith.constant 2 : i32
    %265 = vector.broadcast %c2_i32 : i32 to vector<8x8xi32>
    %266 = arith.cmpi eq, %12, %265 : vector<8x8xi32>
    %267 = vector.shape_cast %264 : vector<8x1xf32> to vector<8x1xf32>
    %268 = vector.broadcast %267 : vector<8x1xf32> to vector<8x8xf32>
    %269 = arith.select %266, %268, %179 : vector<8x8xi1>, vector<8x8xf32>
    %270 = vector.extract_strided_slice %5 {offsets = [0, 2], sizes = [8, 1], strides = [1, 1]} : vector<8x128xf32> to vector<8x1xf32>
    %271 = arith.addf %264, %270 : vector<8x1xf32>
    %cst_81 = arith.constant dense<0xFF800000> : vector<1xf32>
    %272 = vector.multi_reduction <maximumf>, %271, %cst_81 [0] : vector<8x1xf32> to vector<1xf32>
    %273 = vector.shape_cast %272 : vector<1xf32> to vector<1x1xf32>
    %274 = vector.broadcast %273 : vector<1x1xf32> to vector<8x1xf32>
    %275 = arith.cmpf oge, %271, %274 : vector<8x1xf32>
    %276 = arith.sitofp %11 : vector<8x1xi32> to vector<8x1xf32>
    %cst_82 = arith.constant 1.000000e+09 : f32
    %277 = vector.broadcast %cst_82 : f32 to vector<8x1xf32>
    %278 = arith.select %275, %276, %277 : vector<8x1xi1>, vector<8x1xf32>
    %cst_83 = arith.constant dense<0x7F800000> : vector<1xf32>
    %279 = vector.multi_reduction <minimumf>, %278, %cst_83 [0] : vector<8x1xf32> to vector<1xf32>
    %280 = vector.shape_cast %279 : vector<1xf32> to vector<1x1xf32>
    %281 = arith.fptosi %280 : vector<1x1xf32> to vector<1x1xi32>
    %c2_i32_84 = arith.constant 2 : i32
    %282 = vector.broadcast %c2_i32_84 : i32 to vector<1x8xi32>
    %283 = arith.cmpi eq, %13, %282 : vector<1x8xi32>
    %284 = vector.shape_cast %281 : vector<1x1xi32> to vector<1x1xi32>
    %285 = vector.broadcast %284 : vector<1x1xi32> to vector<1x8xi32>
    %286 = arith.select %283, %285, %196 : vector<1x8xi1>, vector<1x8xi32>
    %287 = vector.broadcast %281 : vector<1x1xi32> to vector<8x128xi32>
    %288 = arith.cmpi eq, %10, %287 : vector<8x128xi32>
    %cst_85 = arith.constant 0.000000e+00 : f32
    %289 = vector.broadcast %cst_85 : f32 to vector<8x128xf32>
    %290 = arith.select %288, %3, %289 : vector<8x128xi1>, vector<8x128xf32>
    %cst_86 = arith.constant dense<0.000000e+00> : vector<128xf32>
    %291 = vector.multi_reduction <add>, %290, %cst_86 [0] : vector<8x128xf32> to vector<128xf32>
    %292 = vector.shape_cast %291 : vector<128xf32> to vector<1x128xf32>
    %293 = arith.addf %292, %228 : vector<1x128xf32>
    %294 = arith.addf %293, %8 : vector<1x128xf32>
    %295 = math.tanh %294 : vector<1x128xf32>
    %296 = vector.extract_strided_slice %295 {offsets = [0, 0], sizes = [1, 32], strides = [1, 1]} : vector<1x128xf32> to vector<1x32xf32>
    %cst_87 = arith.constant 1.000000e+00 : f32
    %297 = vector.broadcast %cst_87 : f32 to vector<1x32xf32>
    %298 = arith.addf %296, %297 : vector<1x32xf32>
    %cst_88 = arith.constant 5.000000e-01 : f32
    %299 = vector.broadcast %cst_88 : f32 to vector<1x32xf32>
    %300 = arith.mulf %299, %298 : vector<1x32xf32>
    %301 = vector.extract_strided_slice %295 {offsets = [0, 32], sizes = [1, 32], strides = [1, 1]} : vector<1x128xf32> to vector<1x32xf32>
    %cst_89 = arith.constant 1.000000e+00 : f32
    %302 = vector.broadcast %cst_89 : f32 to vector<1x32xf32>
    %303 = arith.addf %301, %302 : vector<1x32xf32>
    %cst_90 = arith.constant 5.000000e-01 : f32
    %304 = vector.broadcast %cst_90 : f32 to vector<1x32xf32>
    %305 = arith.mulf %304, %303 : vector<1x32xf32>
    %306 = vector.extract_strided_slice %295 {offsets = [0, 64], sizes = [1, 32], strides = [1, 1]} : vector<1x128xf32> to vector<1x32xf32>
    %307 = vector.extract_strided_slice %295 {offsets = [0, 96], sizes = [1, 32], strides = [1, 1]} : vector<1x128xf32> to vector<1x32xf32>
    %cst_91 = arith.constant 1.000000e+00 : f32
    %308 = vector.broadcast %cst_91 : f32 to vector<1x32xf32>
    %309 = arith.addf %307, %308 : vector<1x32xf32>
    %cst_92 = arith.constant 5.000000e-01 : f32
    %310 = vector.broadcast %cst_92 : f32 to vector<1x32xf32>
    %311 = arith.mulf %310, %309 : vector<1x32xf32>
    %312 = arith.mulf %305, %224 : vector<1x32xf32>
    %313 = arith.mulf %300, %306 : vector<1x32xf32>
    %314 = arith.addf %312, %313 : vector<1x32xf32>
    %315 = math.tanh %314 : vector<1x32xf32>
    %316 = arith.mulf %311, %315 : vector<1x32xf32>
    %317 = arith.truncf %316 : vector<1x32xf32> to vector<1x32xbf16>
    %cst_93 = arith.constant dense<0.000000e+00> : vector<1x128xf32>
    %318 = tpu.matmul %317, %2, %cst_93 {dimension_numbers = #tpu.dot_dimension_numbers<[1], [0], [0], [1], [0, 0, 1, 1], [], []>} : vector<1x32xbf16>, vector<32x128xbf16>, vector<1x128xf32> -> vector<1x128xf32>
    %cst_94 = arith.constant dense<0.000000e+00> : vector<1x128xf32>
    %319 = tpu.matmul %317, %0, %cst_94 {dimension_numbers = #tpu.dot_dimension_numbers<[1], [0], [0], [1], [0, 0, 1, 1], [], []>} : vector<1x32xbf16>, vector<32x128xbf16>, vector<1x128xf32> -> vector<1x128xf32>
    %320 = arith.addf %319, %255 : vector<1x128xf32>
    %321 = arith.addf %320, %9 : vector<1x128xf32>
    %322 = math.tanh %321 : vector<1x128xf32>
    %323 = vector.extract_strided_slice %322 {offsets = [0, 0], sizes = [1, 32], strides = [1, 1]} : vector<1x128xf32> to vector<1x32xf32>
    %cst_95 = arith.constant 1.000000e+00 : f32
    %324 = vector.broadcast %cst_95 : f32 to vector<1x32xf32>
    %325 = arith.addf %323, %324 : vector<1x32xf32>
    %cst_96 = arith.constant 5.000000e-01 : f32
    %326 = vector.broadcast %cst_96 : f32 to vector<1x32xf32>
    %327 = arith.mulf %326, %325 : vector<1x32xf32>
    %328 = vector.extract_strided_slice %322 {offsets = [0, 32], sizes = [1, 32], strides = [1, 1]} : vector<1x128xf32> to vector<1x32xf32>
    %cst_97 = arith.constant 1.000000e+00 : f32
    %329 = vector.broadcast %cst_97 : f32 to vector<1x32xf32>
    %330 = arith.addf %328, %329 : vector<1x32xf32>
    %cst_98 = arith.constant 5.000000e-01 : f32
    %331 = vector.broadcast %cst_98 : f32 to vector<1x32xf32>
    %332 = arith.mulf %331, %330 : vector<1x32xf32>
    %333 = vector.extract_strided_slice %322 {offsets = [0, 64], sizes = [1, 32], strides = [1, 1]} : vector<1x128xf32> to vector<1x32xf32>
    %334 = vector.extract_strided_slice %322 {offsets = [0, 96], sizes = [1, 32], strides = [1, 1]} : vector<1x128xf32> to vector<1x32xf32>
    %cst_99 = arith.constant 1.000000e+00 : f32
    %335 = vector.broadcast %cst_99 : f32 to vector<1x32xf32>
    %336 = arith.addf %334, %335 : vector<1x32xf32>
    %cst_100 = arith.constant 5.000000e-01 : f32
    %337 = vector.broadcast %cst_100 : f32 to vector<1x32xf32>
    %338 = arith.mulf %337, %336 : vector<1x32xf32>
    %339 = arith.mulf %332, %251 : vector<1x32xf32>
    %340 = arith.mulf %327, %333 : vector<1x32xf32>
    %341 = arith.addf %339, %340 : vector<1x32xf32>
    %342 = math.tanh %341 : vector<1x32xf32>
    %343 = arith.mulf %338, %342 : vector<1x32xf32>
    %344 = arith.truncf %343 : vector<1x32xf32> to vector<1x32xbf16>
    %cst_101 = arith.constant dense<0.000000e+00> : vector<1x128xf32>
    %345 = tpu.matmul %344, %1, %cst_101 {dimension_numbers = #tpu.dot_dimension_numbers<[1], [0], [0], [1], [0, 0, 1, 1], [], []>} : vector<1x32xbf16>, vector<32x128xbf16>, vector<1x128xf32> -> vector<1x128xf32>
    %346 = vector.broadcast %343 : vector<1x32xf32> to vector<8x32xf32>
    %347 = arith.mulf %346, %4 : vector<8x32xf32>
    %cst_102 = arith.constant dense<0.000000e+00> : vector<8xf32>
    %348 = vector.multi_reduction <add>, %347, %cst_102 [1] : vector<8x32xf32> to vector<8xf32>
    %349 = vector.shape_cast %348 : vector<8xf32> to vector<8x1xf32>
    %350 = arith.addf %349, %6 : vector<8x1xf32>
    %351 = math.tanh %350 : vector<8x1xf32>
    %cst_103 = arith.constant 2.500000e+00 : f32
    %352 = vector.broadcast %cst_103 : f32 to vector<8x1xf32>
    %353 = arith.mulf %352, %351 : vector<8x1xf32>
    %354 = arith.addf %353, %18 : vector<8x1xf32>
    %c3_i32 = arith.constant 3 : i32
    %355 = vector.broadcast %c3_i32 : i32 to vector<8x8xi32>
    %356 = arith.cmpi eq, %12, %355 : vector<8x8xi32>
    %357 = vector.shape_cast %354 : vector<8x1xf32> to vector<8x1xf32>
    %358 = vector.broadcast %357 : vector<8x1xf32> to vector<8x8xf32>
    %359 = arith.select %356, %358, %269 : vector<8x8xi1>, vector<8x8xf32>
    %360 = vector.extract_strided_slice %5 {offsets = [0, 3], sizes = [8, 1], strides = [1, 1]} : vector<8x128xf32> to vector<8x1xf32>
    %361 = arith.addf %354, %360 : vector<8x1xf32>
    %cst_104 = arith.constant dense<0xFF800000> : vector<1xf32>
    %362 = vector.multi_reduction <maximumf>, %361, %cst_104 [0] : vector<8x1xf32> to vector<1xf32>
    %363 = vector.shape_cast %362 : vector<1xf32> to vector<1x1xf32>
    %364 = vector.broadcast %363 : vector<1x1xf32> to vector<8x1xf32>
    %365 = arith.cmpf oge, %361, %364 : vector<8x1xf32>
    %366 = arith.sitofp %11 : vector<8x1xi32> to vector<8x1xf32>
    %cst_105 = arith.constant 1.000000e+09 : f32
    %367 = vector.broadcast %cst_105 : f32 to vector<8x1xf32>
    %368 = arith.select %365, %366, %367 : vector<8x1xi1>, vector<8x1xf32>
    %cst_106 = arith.constant dense<0x7F800000> : vector<1xf32>
    %369 = vector.multi_reduction <minimumf>, %368, %cst_106 [0] : vector<8x1xf32> to vector<1xf32>
    %370 = vector.shape_cast %369 : vector<1xf32> to vector<1x1xf32>
    %371 = arith.fptosi %370 : vector<1x1xf32> to vector<1x1xi32>
    %c3_i32_107 = arith.constant 3 : i32
    %372 = vector.broadcast %c3_i32_107 : i32 to vector<1x8xi32>
    %373 = arith.cmpi eq, %13, %372 : vector<1x8xi32>
    %374 = vector.shape_cast %371 : vector<1x1xi32> to vector<1x1xi32>
    %375 = vector.broadcast %374 : vector<1x1xi32> to vector<1x8xi32>
    %376 = arith.select %373, %375, %286 : vector<1x8xi1>, vector<1x8xi32>
    %377 = vector.broadcast %371 : vector<1x1xi32> to vector<8x128xi32>
    %378 = arith.cmpi eq, %10, %377 : vector<8x128xi32>
    %cst_108 = arith.constant 0.000000e+00 : f32
    %379 = vector.broadcast %cst_108 : f32 to vector<8x128xf32>
    %380 = arith.select %378, %3, %379 : vector<8x128xi1>, vector<8x128xf32>
    %cst_109 = arith.constant dense<0.000000e+00> : vector<128xf32>
    %381 = vector.multi_reduction <add>, %380, %cst_109 [0] : vector<8x128xf32> to vector<128xf32>
    %382 = vector.shape_cast %381 : vector<128xf32> to vector<1x128xf32>
    %383 = arith.addf %382, %318 : vector<1x128xf32>
    %384 = arith.addf %383, %8 : vector<1x128xf32>
    %385 = math.tanh %384 : vector<1x128xf32>
    %386 = vector.extract_strided_slice %385 {offsets = [0, 0], sizes = [1, 32], strides = [1, 1]} : vector<1x128xf32> to vector<1x32xf32>
    %cst_110 = arith.constant 1.000000e+00 : f32
    %387 = vector.broadcast %cst_110 : f32 to vector<1x32xf32>
    %388 = arith.addf %386, %387 : vector<1x32xf32>
    %cst_111 = arith.constant 5.000000e-01 : f32
    %389 = vector.broadcast %cst_111 : f32 to vector<1x32xf32>
    %390 = arith.mulf %389, %388 : vector<1x32xf32>
    %391 = vector.extract_strided_slice %385 {offsets = [0, 32], sizes = [1, 32], strides = [1, 1]} : vector<1x128xf32> to vector<1x32xf32>
    %cst_112 = arith.constant 1.000000e+00 : f32
    %392 = vector.broadcast %cst_112 : f32 to vector<1x32xf32>
    %393 = arith.addf %391, %392 : vector<1x32xf32>
    %cst_113 = arith.constant 5.000000e-01 : f32
    %394 = vector.broadcast %cst_113 : f32 to vector<1x32xf32>
    %395 = arith.mulf %394, %393 : vector<1x32xf32>
    %396 = vector.extract_strided_slice %385 {offsets = [0, 64], sizes = [1, 32], strides = [1, 1]} : vector<1x128xf32> to vector<1x32xf32>
    %397 = vector.extract_strided_slice %385 {offsets = [0, 96], sizes = [1, 32], strides = [1, 1]} : vector<1x128xf32> to vector<1x32xf32>
    %cst_114 = arith.constant 1.000000e+00 : f32
    %398 = vector.broadcast %cst_114 : f32 to vector<1x32xf32>
    %399 = arith.addf %397, %398 : vector<1x32xf32>
    %cst_115 = arith.constant 5.000000e-01 : f32
    %400 = vector.broadcast %cst_115 : f32 to vector<1x32xf32>
    %401 = arith.mulf %400, %399 : vector<1x32xf32>
    %402 = arith.mulf %395, %314 : vector<1x32xf32>
    %403 = arith.mulf %390, %396 : vector<1x32xf32>
    %404 = arith.addf %402, %403 : vector<1x32xf32>
    %405 = math.tanh %404 : vector<1x32xf32>
    %406 = arith.mulf %401, %405 : vector<1x32xf32>
    %407 = arith.truncf %406 : vector<1x32xf32> to vector<1x32xbf16>
    %cst_116 = arith.constant dense<0.000000e+00> : vector<1x128xf32>
    %408 = tpu.matmul %407, %2, %cst_116 {dimension_numbers = #tpu.dot_dimension_numbers<[1], [0], [0], [1], [0, 0, 1, 1], [], []>} : vector<1x32xbf16>, vector<32x128xbf16>, vector<1x128xf32> -> vector<1x128xf32>
    %cst_117 = arith.constant dense<0.000000e+00> : vector<1x128xf32>
    %409 = tpu.matmul %407, %0, %cst_117 {dimension_numbers = #tpu.dot_dimension_numbers<[1], [0], [0], [1], [0, 0, 1, 1], [], []>} : vector<1x32xbf16>, vector<32x128xbf16>, vector<1x128xf32> -> vector<1x128xf32>
    %410 = arith.addf %409, %345 : vector<1x128xf32>
    %411 = arith.addf %410, %9 : vector<1x128xf32>
    %412 = math.tanh %411 : vector<1x128xf32>
    %413 = vector.extract_strided_slice %412 {offsets = [0, 0], sizes = [1, 32], strides = [1, 1]} : vector<1x128xf32> to vector<1x32xf32>
    %cst_118 = arith.constant 1.000000e+00 : f32
    %414 = vector.broadcast %cst_118 : f32 to vector<1x32xf32>
    %415 = arith.addf %413, %414 : vector<1x32xf32>
    %cst_119 = arith.constant 5.000000e-01 : f32
    %416 = vector.broadcast %cst_119 : f32 to vector<1x32xf32>
    %417 = arith.mulf %416, %415 : vector<1x32xf32>
    %418 = vector.extract_strided_slice %412 {offsets = [0, 32], sizes = [1, 32], strides = [1, 1]} : vector<1x128xf32> to vector<1x32xf32>
    %cst_120 = arith.constant 1.000000e+00 : f32
    %419 = vector.broadcast %cst_120 : f32 to vector<1x32xf32>
    %420 = arith.addf %418, %419 : vector<1x32xf32>
    %cst_121 = arith.constant 5.000000e-01 : f32
    %421 = vector.broadcast %cst_121 : f32 to vector<1x32xf32>
    %422 = arith.mulf %421, %420 : vector<1x32xf32>
    %423 = vector.extract_strided_slice %412 {offsets = [0, 64], sizes = [1, 32], strides = [1, 1]} : vector<1x128xf32> to vector<1x32xf32>
    %424 = vector.extract_strided_slice %412 {offsets = [0, 96], sizes = [1, 32], strides = [1, 1]} : vector<1x128xf32> to vector<1x32xf32>
    %cst_122 = arith.constant 1.000000e+00 : f32
    %425 = vector.broadcast %cst_122 : f32 to vector<1x32xf32>
    %426 = arith.addf %424, %425 : vector<1x32xf32>
    %cst_123 = arith.constant 5.000000e-01 : f32
    %427 = vector.broadcast %cst_123 : f32 to vector<1x32xf32>
    %428 = arith.mulf %427, %426 : vector<1x32xf32>
    %429 = arith.mulf %422, %341 : vector<1x32xf32>
    %430 = arith.mulf %417, %423 : vector<1x32xf32>
    %431 = arith.addf %429, %430 : vector<1x32xf32>
    %432 = math.tanh %431 : vector<1x32xf32>
    %433 = arith.mulf %428, %432 : vector<1x32xf32>
    %434 = arith.truncf %433 : vector<1x32xf32> to vector<1x32xbf16>
    %cst_124 = arith.constant dense<0.000000e+00> : vector<1x128xf32>
    %435 = tpu.matmul %434, %1, %cst_124 {dimension_numbers = #tpu.dot_dimension_numbers<[1], [0], [0], [1], [0, 0, 1, 1], [], []>} : vector<1x32xbf16>, vector<32x128xbf16>, vector<1x128xf32> -> vector<1x128xf32>
    %436 = vector.broadcast %433 : vector<1x32xf32> to vector<8x32xf32>
    %437 = arith.mulf %436, %4 : vector<8x32xf32>
    %cst_125 = arith.constant dense<0.000000e+00> : vector<8xf32>
    %438 = vector.multi_reduction <add>, %437, %cst_125 [1] : vector<8x32xf32> to vector<8xf32>
    %439 = vector.shape_cast %438 : vector<8xf32> to vector<8x1xf32>
    %440 = arith.addf %439, %6 : vector<8x1xf32>
    %441 = math.tanh %440 : vector<8x1xf32>
    %cst_126 = arith.constant 2.500000e+00 : f32
    %442 = vector.broadcast %cst_126 : f32 to vector<8x1xf32>
    %443 = arith.mulf %442, %441 : vector<8x1xf32>
    %444 = arith.addf %443, %18 : vector<8x1xf32>
    %c4_i32 = arith.constant 4 : i32
    %445 = vector.broadcast %c4_i32 : i32 to vector<8x8xi32>
    %446 = arith.cmpi eq, %12, %445 : vector<8x8xi32>
    %447 = vector.shape_cast %444 : vector<8x1xf32> to vector<8x1xf32>
    %448 = vector.broadcast %447 : vector<8x1xf32> to vector<8x8xf32>
    %449 = arith.select %446, %448, %359 : vector<8x8xi1>, vector<8x8xf32>
    %450 = vector.extract_strided_slice %5 {offsets = [0, 4], sizes = [8, 1], strides = [1, 1]} : vector<8x128xf32> to vector<8x1xf32>
    %451 = arith.addf %444, %450 : vector<8x1xf32>
    %cst_127 = arith.constant dense<0xFF800000> : vector<1xf32>
    %452 = vector.multi_reduction <maximumf>, %451, %cst_127 [0] : vector<8x1xf32> to vector<1xf32>
    %453 = vector.shape_cast %452 : vector<1xf32> to vector<1x1xf32>
    %454 = vector.broadcast %453 : vector<1x1xf32> to vector<8x1xf32>
    %455 = arith.cmpf oge, %451, %454 : vector<8x1xf32>
    %456 = arith.sitofp %11 : vector<8x1xi32> to vector<8x1xf32>
    %cst_128 = arith.constant 1.000000e+09 : f32
    %457 = vector.broadcast %cst_128 : f32 to vector<8x1xf32>
    %458 = arith.select %455, %456, %457 : vector<8x1xi1>, vector<8x1xf32>
    %cst_129 = arith.constant dense<0x7F800000> : vector<1xf32>
    %459 = vector.multi_reduction <minimumf>, %458, %cst_129 [0] : vector<8x1xf32> to vector<1xf32>
    %460 = vector.shape_cast %459 : vector<1xf32> to vector<1x1xf32>
    %461 = arith.fptosi %460 : vector<1x1xf32> to vector<1x1xi32>
    %c4_i32_130 = arith.constant 4 : i32
    %462 = vector.broadcast %c4_i32_130 : i32 to vector<1x8xi32>
    %463 = arith.cmpi eq, %13, %462 : vector<1x8xi32>
    %464 = vector.shape_cast %461 : vector<1x1xi32> to vector<1x1xi32>
    %465 = vector.broadcast %464 : vector<1x1xi32> to vector<1x8xi32>
    %466 = arith.select %463, %465, %376 : vector<1x8xi1>, vector<1x8xi32>
    %467 = vector.broadcast %461 : vector<1x1xi32> to vector<8x128xi32>
    %468 = arith.cmpi eq, %10, %467 : vector<8x128xi32>
    %cst_131 = arith.constant 0.000000e+00 : f32
    %469 = vector.broadcast %cst_131 : f32 to vector<8x128xf32>
    %470 = arith.select %468, %3, %469 : vector<8x128xi1>, vector<8x128xf32>
    %cst_132 = arith.constant dense<0.000000e+00> : vector<128xf32>
    %471 = vector.multi_reduction <add>, %470, %cst_132 [0] : vector<8x128xf32> to vector<128xf32>
    %472 = vector.shape_cast %471 : vector<128xf32> to vector<1x128xf32>
    %473 = arith.addf %472, %408 : vector<1x128xf32>
    %474 = arith.addf %473, %8 : vector<1x128xf32>
    %475 = math.tanh %474 : vector<1x128xf32>
    %476 = vector.extract_strided_slice %475 {offsets = [0, 0], sizes = [1, 32], strides = [1, 1]} : vector<1x128xf32> to vector<1x32xf32>
    %cst_133 = arith.constant 1.000000e+00 : f32
    %477 = vector.broadcast %cst_133 : f32 to vector<1x32xf32>
    %478 = arith.addf %476, %477 : vector<1x32xf32>
    %cst_134 = arith.constant 5.000000e-01 : f32
    %479 = vector.broadcast %cst_134 : f32 to vector<1x32xf32>
    %480 = arith.mulf %479, %478 : vector<1x32xf32>
    %481 = vector.extract_strided_slice %475 {offsets = [0, 32], sizes = [1, 32], strides = [1, 1]} : vector<1x128xf32> to vector<1x32xf32>
    %cst_135 = arith.constant 1.000000e+00 : f32
    %482 = vector.broadcast %cst_135 : f32 to vector<1x32xf32>
    %483 = arith.addf %481, %482 : vector<1x32xf32>
    %cst_136 = arith.constant 5.000000e-01 : f32
    %484 = vector.broadcast %cst_136 : f32 to vector<1x32xf32>
    %485 = arith.mulf %484, %483 : vector<1x32xf32>
    %486 = vector.extract_strided_slice %475 {offsets = [0, 64], sizes = [1, 32], strides = [1, 1]} : vector<1x128xf32> to vector<1x32xf32>
    %487 = vector.extract_strided_slice %475 {offsets = [0, 96], sizes = [1, 32], strides = [1, 1]} : vector<1x128xf32> to vector<1x32xf32>
    %cst_137 = arith.constant 1.000000e+00 : f32
    %488 = vector.broadcast %cst_137 : f32 to vector<1x32xf32>
    %489 = arith.addf %487, %488 : vector<1x32xf32>
    %cst_138 = arith.constant 5.000000e-01 : f32
    %490 = vector.broadcast %cst_138 : f32 to vector<1x32xf32>
    %491 = arith.mulf %490, %489 : vector<1x32xf32>
    %492 = arith.mulf %485, %404 : vector<1x32xf32>
    %493 = arith.mulf %480, %486 : vector<1x32xf32>
    %494 = arith.addf %492, %493 : vector<1x32xf32>
    %495 = math.tanh %494 : vector<1x32xf32>
    %496 = arith.mulf %491, %495 : vector<1x32xf32>
    %497 = arith.truncf %496 : vector<1x32xf32> to vector<1x32xbf16>
    %cst_139 = arith.constant dense<0.000000e+00> : vector<1x128xf32>
    %498 = tpu.matmul %497, %0, %cst_139 {dimension_numbers = #tpu.dot_dimension_numbers<[1], [0], [0], [1], [0, 0, 1, 1], [], []>} : vector<1x32xbf16>, vector<32x128xbf16>, vector<1x128xf32> -> vector<1x128xf32>
    %499 = arith.addf %498, %435 : vector<1x128xf32>
    %500 = arith.addf %499, %9 : vector<1x128xf32>
    %501 = math.tanh %500 : vector<1x128xf32>
    %502 = vector.extract_strided_slice %501 {offsets = [0, 0], sizes = [1, 32], strides = [1, 1]} : vector<1x128xf32> to vector<1x32xf32>
    %cst_140 = arith.constant 1.000000e+00 : f32
    %503 = vector.broadcast %cst_140 : f32 to vector<1x32xf32>
    %504 = arith.addf %502, %503 : vector<1x32xf32>
    %cst_141 = arith.constant 5.000000e-01 : f32
    %505 = vector.broadcast %cst_141 : f32 to vector<1x32xf32>
    %506 = arith.mulf %505, %504 : vector<1x32xf32>
    %507 = vector.extract_strided_slice %501 {offsets = [0, 32], sizes = [1, 32], strides = [1, 1]} : vector<1x128xf32> to vector<1x32xf32>
    %cst_142 = arith.constant 1.000000e+00 : f32
    %508 = vector.broadcast %cst_142 : f32 to vector<1x32xf32>
    %509 = arith.addf %507, %508 : vector<1x32xf32>
    %cst_143 = arith.constant 5.000000e-01 : f32
    %510 = vector.broadcast %cst_143 : f32 to vector<1x32xf32>
    %511 = arith.mulf %510, %509 : vector<1x32xf32>
    %512 = vector.extract_strided_slice %501 {offsets = [0, 64], sizes = [1, 32], strides = [1, 1]} : vector<1x128xf32> to vector<1x32xf32>
    %513 = vector.extract_strided_slice %501 {offsets = [0, 96], sizes = [1, 32], strides = [1, 1]} : vector<1x128xf32> to vector<1x32xf32>
    %cst_144 = arith.constant 1.000000e+00 : f32
    %514 = vector.broadcast %cst_144 : f32 to vector<1x32xf32>
    %515 = arith.addf %513, %514 : vector<1x32xf32>
    %cst_145 = arith.constant 5.000000e-01 : f32
    %516 = vector.broadcast %cst_145 : f32 to vector<1x32xf32>
    %517 = arith.mulf %516, %515 : vector<1x32xf32>
    %518 = arith.mulf %511, %431 : vector<1x32xf32>
    %519 = arith.mulf %506, %512 : vector<1x32xf32>
    %520 = arith.addf %518, %519 : vector<1x32xf32>
    %521 = math.tanh %520 : vector<1x32xf32>
    %522 = arith.mulf %517, %521 : vector<1x32xf32>
    %523 = vector.broadcast %522 : vector<1x32xf32> to vector<8x32xf32>
    %524 = arith.mulf %523, %4 : vector<8x32xf32>
    %cst_146 = arith.constant dense<0.000000e+00> : vector<8xf32>
    %525 = vector.multi_reduction <add>, %524, %cst_146 [1] : vector<8x32xf32> to vector<8xf32>
    %526 = vector.shape_cast %525 : vector<8xf32> to vector<8x1xf32>
    %527 = arith.addf %526, %6 : vector<8x1xf32>
    %528 = math.tanh %527 : vector<8x1xf32>
    %cst_147 = arith.constant 2.500000e+00 : f32
    %529 = vector.broadcast %cst_147 : f32 to vector<8x1xf32>
    %530 = arith.mulf %529, %528 : vector<8x1xf32>
    %531 = arith.addf %530, %18 : vector<8x1xf32>
    %c5_i32_148 = arith.constant 5 : i32
    %532 = vector.broadcast %c5_i32_148 : i32 to vector<8x8xi32>
    %533 = arith.cmpi eq, %12, %532 : vector<8x8xi32>
    %534 = vector.shape_cast %531 : vector<8x1xf32> to vector<8x1xf32>
    %535 = vector.broadcast %534 : vector<8x1xf32> to vector<8x8xf32>
    %536 = arith.select %533, %535, %449 : vector<8x8xi1>, vector<8x8xf32>
    %537 = vector.extract_strided_slice %5 {offsets = [0, 5], sizes = [8, 1], strides = [1, 1]} : vector<8x128xf32> to vector<8x1xf32>
    %538 = arith.addf %531, %537 : vector<8x1xf32>
    %cst_149 = arith.constant dense<0xFF800000> : vector<1xf32>
    %539 = vector.multi_reduction <maximumf>, %538, %cst_149 [0] : vector<8x1xf32> to vector<1xf32>
    %540 = vector.shape_cast %539 : vector<1xf32> to vector<1x1xf32>
    %541 = vector.broadcast %540 : vector<1x1xf32> to vector<8x1xf32>
    %542 = arith.cmpf oge, %538, %541 : vector<8x1xf32>
    %543 = arith.sitofp %11 : vector<8x1xi32> to vector<8x1xf32>
    %cst_150 = arith.constant 1.000000e+09 : f32
    %544 = vector.broadcast %cst_150 : f32 to vector<8x1xf32>
    %545 = arith.select %542, %543, %544 : vector<8x1xi1>, vector<8x1xf32>
    %cst_151 = arith.constant dense<0x7F800000> : vector<1xf32>
    %546 = vector.multi_reduction <minimumf>, %545, %cst_151 [0] : vector<8x1xf32> to vector<1xf32>
    %547 = vector.shape_cast %546 : vector<1xf32> to vector<1x1xf32>
    %548 = arith.fptosi %547 : vector<1x1xf32> to vector<1x1xi32>
    %c5_i32_152 = arith.constant 5 : i32
    %549 = vector.broadcast %c5_i32_152 : i32 to vector<1x8xi32>
    %550 = arith.cmpi eq, %13, %549 : vector<1x8xi32>
    %551 = vector.shape_cast %548 : vector<1x1xi32> to vector<1x1xi32>
    %552 = vector.broadcast %551 : vector<1x1xi32> to vector<1x8xi32>
    %553 = arith.select %550, %552, %466 : vector<1x8xi1>, vector<1x8xi32>
    %cst_153 = arith.constant dense<0xFF800000> : vector<8xf32>
    %554 = vector.multi_reduction <maximumf>, %536, %cst_153 [0] : vector<8x8xf32> to vector<8xf32>
    %555 = vector.shape_cast %554 : vector<8xf32> to vector<1x8xf32>
    %556 = vector.broadcast %555 : vector<1x8xf32> to vector<8x8xf32>
    %557 = arith.subf %536, %556 : vector<8x8xf32>
    %558 = math.exp %557 : vector<8x8xf32>
    %cst_154 = arith.constant dense<0.000000e+00> : vector<8xf32>
    %559 = vector.multi_reduction <add>, %558, %cst_154 [0] : vector<8x8xf32> to vector<8xf32>
    %560 = vector.shape_cast %559 : vector<8xf32> to vector<1x8xf32>
    %561 = vector.broadcast %560 : vector<1x8xf32> to vector<8x8xf32>
    %562 = arith.divf %558, %561 : vector<8x8xf32>
    %563 = vector.broadcast %555 : vector<1x8xf32> to vector<8x8xf32>
    %564 = arith.subf %536, %563 : vector<8x8xf32>
    %565 = math.log %560 : vector<1x8xf32>
    %566 = vector.broadcast %565 : vector<1x8xf32> to vector<8x8xf32>
    %567 = arith.subf %564, %566 : vector<8x8xf32>
    %568 = vector.broadcast %11 : vector<8x1xi32> to vector<8x8xi32>
    %569 = vector.broadcast %553 : vector<1x8xi32> to vector<8x8xi32>
    %570 = arith.cmpi eq, %568, %569 : vector<8x8xi32>
    %571 = arith.extui %570 : vector<8x8xi1> to vector<8x8xi32>
    %572 = arith.sitofp %571 : vector<8x8xi32> to vector<8x8xf32>
    %c6_i32 = arith.constant 6 : i32
    %573 = vector.broadcast %c6_i32 : i32 to vector<1x8xi32>
    %574 = arith.cmpi slt, %13, %573 : vector<1x8xi32>
    %575 = arith.extui %574 : vector<1x8xi1> to vector<1x8xi32>
    %576 = arith.sitofp %575 : vector<1x8xi32> to vector<1x8xf32>
    %577 = arith.mulf %567, %572 : vector<8x8xf32>
    %cst_155 = arith.constant dense<0.000000e+00> : vector<8xf32>
    %578 = vector.multi_reduction <add>, %577, %cst_155 [0] : vector<8x8xf32> to vector<8xf32>
    %579 = vector.shape_cast %578 : vector<8xf32> to vector<1x8xf32>
    %580 = arith.mulf %579, %576 : vector<1x8xf32>
    %cst_156 = arith.constant dense<0.000000e+00> : vector<1xf32>
    %581 = vector.multi_reduction <add>, %580, %cst_156 [1] : vector<1x8xf32> to vector<1xf32>
    %582 = vector.shape_cast %581 : vector<1xf32> to vector<1x1xf32>
    %583 = arith.mulf %562, %567 : vector<8x8xf32>
    %cst_157 = arith.constant dense<0.000000e+00> : vector<8xf32>
    %584 = vector.multi_reduction <add>, %583, %cst_157 [0] : vector<8x8xf32> to vector<8xf32>
    %585 = vector.shape_cast %584 : vector<8xf32> to vector<1x8xf32>
    %586 = arith.mulf %585, %576 : vector<1x8xf32>
    %cst_158 = arith.constant dense<0.000000e+00> : vector<1xf32>
    %587 = vector.multi_reduction <add>, %586, %cst_158 [1] : vector<1x8xf32> to vector<1xf32>
    %588 = vector.shape_cast %587 : vector<1xf32> to vector<1x1xf32>
    %cst_159 = arith.constant 0.000000e+00 : f32
    %589 = vector.broadcast %cst_159 : f32 to vector<1x1xf32>
    %590 = arith.subf %589, %588 : vector<1x1xf32>
    %cst_160 = arith.constant 0.000000e+00 : f32
    %591 = vector.broadcast %cst_160 : f32 to vector<8x128xf32>
    %c0_161 = arith.constant 0 : index
    %c0_162 = arith.constant 0 : index
    %592 = vector.load %arg2[%c0_161, %c0_162] : memref<8x128xf32, #tpu.memory_space<vmem>>, vector<8x128xf32>
    tpu.vector_store %arg2[%c0_161, %c0_162], %591 {strides = array<i32>} : memref<8x128xf32, #tpu.memory_space<vmem>>, vector<8x128xf32>,
    %c0_163 = arith.constant 0 : index
    %c0_164 = arith.constant 0 : index
    %593 = vector.load %arg2[%c0_163, %c0_164] : memref<8x128xf32, #tpu.memory_space<vmem>>, vector<8x8xf32>
    tpu.vector_store %arg2[%c0_163, %c0_164], %562 {strides = array<i32>} : memref<8x128xf32, #tpu.memory_space<vmem>>, vector<8x8xf32>,
    %c0_165 = arith.constant 0 : index
    %c8_166 = arith.constant 8 : index
    %594 = vector.load %arg2[%c0_165, %c8_166] : memref<8x128xf32, #tpu.memory_space<vmem>>, vector<1x1xf32>
    tpu.vector_store %arg2[%c0_165, %c8_166], %582 {strides = array<i32>} : memref<8x128xf32, #tpu.memory_space<vmem>>, vector<1x1xf32>,
    %c0_167 = arith.constant 0 : index
    %c9 = arith.constant 9 : index
    %595 = vector.load %arg2[%c0_167, %c9] : memref<8x128xf32, #tpu.memory_space<vmem>>, vector<1x1xf32>
    tpu.vector_store %arg2[%c0_167, %c9], %590 {strides = array<i32>} : memref<8x128xf32, #tpu.memory_space<vmem>>, vector<1x1xf32>,
    %596 = arith.sitofp %553 : vector<1x8xi32> to vector<1x8xf32>
    %c1 = arith.constant 1 : index
    %c8_168 = arith.constant 8 : index
    %597 = vector.load %arg2[%c1, %c8_168] : memref<8x128xf32, #tpu.memory_space<vmem>>, vector<1x8xf32>
    tpu.vector_store %arg2[%c1, %c8_168], %596 {strides = array<i32>} : memref<8x128xf32, #tpu.memory_space<vmem>>, vector<1x8xf32>,
    return
  }
}

</mosaic_0001>

<bundles_post_ra>
// kernel: controller201_forward.1
= control target key start
LH: loop header
LB: loop body
LE: loop exit
PB: predicated region body
PF: predicated region fallthrough
CT: control target
= control target key end

     0   :  { %s1753_s13 = smov 64   ;;  %s1754_s14 = smov 32   ;;  %v1755_v11 = vmov 0.0   ;;  %vm1756_vm0 = vmmov 0   ;;  %vm74_vm1 = vcmask 261120   ;;  %v31_v41 = vlaneseq  ;;  %s2265_s1 = inlined_call_operand.vmem [shape: f32[40,128], index: 1, kind: input, shape index: {}]   ;;  %s2266_s0 = inlined_call_operand.vmem [shape: bf16[96,128], index: 0, kind: input, shape index: {}]   ;;  %s2267_s2 = inlined_call_operand.vmem [shape: f32[8,128], index: 2, kind: output, shape index: {}]  }
   0x1   :  { %v28_v0 = vld [vmem:[%s2265_s1 + $0x20] sm:$0x1]  ;;  %v1787_v1 = vld [vmem:[%s2265_s1 + $0x21] sm:$0x1]  ;;  %1522 = vmatprep.subr.bf16.mxu0 %v1755_v11  ;;  %1530 = vmatprep.subr.bf16.mxu1 %v1755_v11  ;;  %v1815_v14 = vld [vmem:[%s2266_s0 + $0x28] sm:$0xff]   ;;  %s1757_s27 = smov 96   ;;  %1433 = vst [vmem:[%s2267_s2] sm:$0xff] %v1755_v11 }
   0x2   :  { %v37_v2 = vadd.f32 %v1787_v1, %v28_v0  ;;  %v1800_v12 = vld [vmem:[%s2266_s0 + $0x20] sm:$0xff]   ;;  %1526 = vmatprep.mubr.msk.bf16.mxu0 %vm1756_vm0, %v1755_v11  ;;  %1534 = vmatprep.mubr.msk.bf16.mxu1 %vm1756_vm0, %v1755_v11  ;;  %v1822_v15 = vld [vmem:[%s2266_s0 + $0x8] sm:$0xff]   ;;  %v1859_v42 = vshrl.u32 %v31_v41, 7  ;;  %v1758_v51 = vmov 0   ;;  %v1876_v52 = vld [vmem:[%s2265_s1 + $0x18] sm:$0xff]  ;;  %vm277_vm3 = vcmask 7168  }
   0x3   :  { %v1805_v13 = vld [vmem:[%s2266_s0] sm:$0xff]   ;;  %1523 = vmatpush3.bf16.msra.mxu0 %v1800_v12  ;;  %v25_v36 = vld [vmem:[%s2265_s1 + $0x8] sm:$0xff]  ;;  %1675 = vset.pattern.permute.xlu0 %v1758_v51  ;;  %v1759_v56 = vmov -1e+30   ;;  %v1885_v59 = vld [vmem:[%s2265_s1 + $0x10] sm:$0xff]  ;;  %s1761_s10 = smov 126  }
   0x4   :  { %1683 = vtanh.f32 %v37_v2  ;;  %1531 = vmatpush3.bf16.msra.mxu1 %v1805_v13  ;;  %1524 = vmatprep.subr.bf16.mxu0 %v1755_v11  ;;  %v1844_v21 = vld [vmem:[%s2265_s1 + $0x22] sm:$0x1]  ;;  %v1862_v43 = vsub.s32 0, %v1859_v42  ;;  %vm35_vm2 = vcmp.lt.s32.totalorder %v1859_v42, 5  ;;  %s1762_s11 = smov 125   ;;  %s1763_s12 = smov 124  }
   0x5   :  { %1532 = vmatprep.subr.bf16.mxu1 %v1755_v11  ;;  %1676 = vset.pattern.permute.xlu1 %v1758_v51  ;;  %v1880_v57 = vsel %vm35_vm2, 0.0, %v1759_v56  ;;  %s1764_s21 = smov 123   ;;  %s1765_s25 = smov 8  }
   0x7   :  { %1525 = vmatpush3.bf16.msra.mxu0 %v1815_v14 }
   0x8   :  { %1533 = vmatpush3.bf16.msra.mxu1 %v1822_v15  ;;  %1538 = vmatprep.subr.bf16.mxu0 %v1755_v11 }
   0x9   :  { %1546 = vmatprep.subr.bf16.mxu1 %v1755_v11 }
   0xe   :  { %v1684_v3 = vpop.eup %1683 }
   0xf   :  { %43 = vrot.lane.b32.xlu0 %v1684_v3, %s1753_s13  ;;  %v39_v4 = vadd.f32 1.0, %v1684_v3 }
  0x11   :  { %v40_v5 = vmul.f32 0.5, %v39_v4 }
  0x13   :  { %v41_v8 = vmul.f32 0.0, %v40_v5 }
  0x81   :  { %v44_v6 = vpop.permute.xlu0 %43 }
  0x82   :  { %v46_v7 = vmul.f32 %v44_v6, %v40_v5 }
  0x84   :  { %48 = vrot.lane.b32.xlu0 %v46_v7, %s1754_s14 }
  0xf6   :  { %v49_v9 = vpop.permute.xlu0 %48 }
  0xf7   :  { %v1792_v10 = vadd.f32 %v49_v9, %v41_v8 }
  0xf9   :  { %1685 = vtanh.f32 %v1792_v10 }
 0x103   :  { %v1686_v16 = vpop.eup %1685 }
 0x104   :  { %54 = vrot.lane.b32.xlu1 %v1686_v16, %s1753_s13 }
 0x176   :  { %v55_v17 = vpop.permute.xlu1 %54 }
 0x177   :  { %v57_v18 = vmul.f32 %v55_v17, %v40_v5  ;;  %v1894_v5 = vcvt.s32.f32 %v1859_v42 }
 0x179   :  { %v58_v19 = vpack.c.bf16 %v57_v18, %v57_v18 }
 0x17b   :  { %60 = vrot.lane.b32.xlu1 %v58_v19, %s1754_s14 }
 0x1ed   :  { %v61_v20 = vpop.permute.xlu1 %60 }
 0x1ee   :  { %1527 = vmatmul.mubr.msk.bf16.vlgmr.msra.gmra.mrb[0].mxu0 %vm74_vm1, %v61_v20  ;;  %1535 = vmatmul.mubr.msk.bf16.vlgmr.msra.gmra.mrb[0].mxu1 %vm74_vm1, %v61_v20 }
 0x1ef   :  { %1542 = vmatprep.mubr.msk.bf16.mxu0 %vm1756_vm0, %v1755_v11  ;;  %1547 = vmatpush3.bf16.msra.mxu1 %v1800_v12 }
 0x1f0   :  { %1548 = vmatprep.subr.bf16.mxu1 %v1755_v11  ;;  %1550 = vmatprep.mubr.msk.bf16.mxu1 %vm1756_vm0, %v1755_v11 }
 0x1f3   :  { %1549 = vmatpush3.bf16.msra.mxu1 %v1815_v14 }
 0x1f4   :  { %1562 = vmatprep.subr.bf16.mxu1 %v1755_v11 }
 0x2c1   :  { %v1846_v22 = vpop.f32.mrb[0].mxu0  ;;  %v164_v23 = vpop.f32.mrb[0].mxu1 }
 0x2c2   :  { %v165_v24 = vadd.f32 %v164_v23, %v1844_v21  ;;  %v1528_v25 = vpop.f32.mrb[1].mxu0  ;;  %v1536_v26 = vpop.f32.mrb[1].mxu1 }
 0x2c3   :  { %v115_v27 = vpop.f32.mrb[2].mxu0  ;;  %v167_v28 = vpop.f32.mrb[2].mxu1  ;;  %v1901_v25 = vld [vmem:[%s2265_s1] sm:$0xff] }
 0x2c4   :  { %1687 = vtanh.f32 %v165_v24  ;;  %v1529_v29 = vpop.f32.mrb[3].mxu0  ;;  %v1537_v30 = vpop.f32.mrb[3].mxu1 }
 0x2ce   :  { %v1688_v31 = vpop.eup %1687 }
 0x2cf   :  { %175 = vrot.lane.b32.xlu0 %v1688_v31, %s1753_s13  ;;  %v171_v32 = vadd.f32 1.0, %v1688_v31 }
 0x2d1   :  { %v172_v33 = vmul.f32 0.5, %v171_v32 }
 0x2d3   :  { %v173_v37 = vmul.f32 0.0, %v172_v33 }
 0x341   :  { %v176_v34 = vpop.permute.xlu0 %175 }
 0x342   :  { %v178_v35 = vmul.f32 %v176_v34, %v172_v33 }
 0x344   :  { %180 = vrot.lane.b32.xlu1 %v178_v35, %s1754_s14 }
 0x348   :  { %254 = vrot.lane.b32.xlu1 %v25_v36, %s1757_s27 }
 0x3b6   :  { %v181_v38 = vpop.permute.xlu1 %180 }
 0x3b7   :  { %v1854_v39 = vadd.f32 %v181_v38, %v173_v37 }
 0x3b9   :  { %1689 = vtanh.f32 %v1854_v39 }
 0x3ba   :  { %v1866_v46 = vpop.permute.xlu1 %254 }
 0x3c3   :  { %v1690_v40 = vpop.eup %1689 }
 0x3c4   :  { %186 = vrot.lane.b32.xlu0 %v1690_v40, %s1753_s13 }
 0x436   :  { %v187_v44 = vpop.permute.xlu0 %186 }
 0x437   :  { %v1864_v45 = vmul.f32 %v187_v44, %v172_v33 }
 0x439   :  { %v252_v47 = vrot.slane %v1864_v45, %v1862_v43 }
 0x43b   :  { %v257_v48 = vmul.f32 %v1866_v46, %v252_v47  ;;  %v1915_v47 = vld [vmem:[%s2266_s0 + $0x10] sm:$0xff]  }
 0x43c   :  { %1539 = vmatpush3.bf16.msra.mxu0 %v1915_v47 }
 0x43d   :  { %259 = vrot.lane.b32.xlu0 %v257_v48, %s1754_s14  ;;  %1540 = vmatprep.subr.bf16.mxu0 %v1755_v11 }
 0x4af   :  { %v260_v49 = vpop.permute.xlu0 %259 }
 0x4b0   :  { %v262_v50 = vsel %vm74_vm1, %v260_v49, 0.0  ;;  %v1923_v49 = vld [vmem:[%s2266_s0 + $0x18] sm:$0xff]   ;;  %s1760_s0 = smov 127  }
 0x4b1   :  { %263 = vadd.xlane.f32.xlu1 %v262_v50  ;;  %1541 = vmatpush3.bf16.msra.mxu0 %v1923_v49 }
 0x4b2   :  { %1554 = vmatprep.subr.bf16.mxu0 %v1755_v11 }
 0x53e   :  { %v264_v53 = vpop.xlane.xlu1 %263 }
 0x53f   :  { %v265_v54 = vadd.f32 %v264_v53, %v1876_v52 }
 0x541   :  { %1691 = vtanh.f32 %v265_v54 }
 0x54b   :  { %v1692_v55 = vpop.eup %1691 }
 0x54c   :  { %v267_v58 = vmul.f32 2.5, %v1692_v55 }
 0x54e   :  { %v1888_v60 = vadd.f32 %v267_v58, %v1880_v57 }
 0x550   :  { %v276_v61 = vadd.f32 %v1888_v60, %v1885_v59 }
 0x552   :  { %v278_v62 = vsel %vm277_vm3, %v276_v61, -inf }
 0x553   :  { %v279_v63 = vrot.slane %v278_v62, 4 }
 0x555   :  { %v280_v0 = vmax.f32 %v278_v62, %v279_v63 }
 0x557   :  { %v281_v2 = vrot.slane %v280_v0, 2 }
 0x559   :  { %v282_v3 = vmax.f32 %v280_v0, %v281_v2 }
 0x55b   :  { %v283_v4 = vrot.slane %v282_v3, 1 }
 0x55d   :  { %v284_v6 = vmax.f32 %v282_v3, %v283_v4 }
 0x55f   :  { %vm285_vm4 = vcmp.ge.f32.partialorder %v276_v61, %v284_v6 }
 0x560   :  { %v287_v7 = vsel %vm285_vm4, %v1894_v5, 1e+09 }
 0x561   :  { %v288_v8 = vsel %vm277_vm3, %v287_v7, inf }
 0x562   :  { %v289_v9 = vrot.slane %v288_v8, 4 }
 0x564   :  { %v290_v16 = vmin.f32 %v288_v8, %v289_v9 }
 0x566   :  { %v291_v17 = vrot.slane %v290_v16, 2 }
 0x568   :  { %v292_v18 = vmin.f32 %v290_v16, %v291_v17 }
 0x56a   :  { %v293_v19 = vrot.slane %v292_v18, 1 }
 0x56c   :  { %v294_v20 = vmin.f32 %v292_v18, %v293_v19 }
 0x56e   :  { %v1650_v23 = vtrunc.f32 %v294_v20 }
 0x570   :  { %v1651_v24 = vcvt.f32.s32 %v1650_v23 }
 0x572   :  { %297 = vperm.xlu0 %1675, %v1651_v24  }
 0x5f1   :  { %v1903_v26 = vpop.permute.xlu0 %297 }
 0x5f2   :  { %vm300_vm5 = vcmp.eq.s32.totalorder %v1859_v42, %v1903_v26 }
 0x5f3   :  { %v301_v27 = vsel %vm300_vm5, %v1901_v25, 0.0  ;;  %vm1379_vm5 = vcmask 64512  }
 0x5f4   :  { %v302_v28 = vrot.slane %v301_v27, 4 }
 0x5f6   :  { %v303_v29 = vadd.f32 %v302_v28, %v301_v27 }
 0x5f8   :  { %v304_v30 = vrot.slane %v303_v29, 2 }
 0x5fa   :  { %v305_v31 = vadd.f32 %v304_v30, %v303_v29 }
 0x5fc   :  { %v306_v32 = vrot.slane %v305_v31, 1 }
 0x5fe   :  { %v307_v33 = vadd.f32 %v306_v32, %v305_v31 }
 0x600   :  { %v308_v34 = vadd.f32 %v307_v33, %v1846_v22 }
 0x602   :  { %v309_v35 = vadd.f32 %v308_v34, %v1787_v1 }
 0x604   :  { %1693 = vtanh.f32 %v309_v35 }
 0x60e   :  { %v1694_v36 = vpop.eup %1693 }
 0x60f   :  { %315 = vrot.lane.b32.xlu0 %v1694_v36, %s1753_s13  ;;  %v311_v37 = vadd.f32 1.0, %v1694_v36 }
 0x611   :  { %v312_v38 = vmul.f32 0.5, %v311_v37 }
 0x613   :  { %v313_v22 = vmul.f32 %v312_v38, %v1792_v10  ;;  %v190_v10 = vpack.c.bf16 %v1864_v45, %v1864_v45 }
 0x681   :  { %v316_v40 = vpop.permute.xlu0 %315 }
 0x682   :  { %v318_v44 = vmul.f32 %v316_v40, %v312_v38 }
 0x684   :  { %320 = vrot.lane.b32.xlu0 %v318_v44, %s1754_s14 }
 0x6f6   :  { %v321_v48 = vpop.permute.xlu0 %320 }
 0x6f7   :  { %v1925_v50 = vadd.f32 %v321_v48, %v313_v22 }
 0x6f9   :  { %1695 = vtanh.f32 %v1925_v50 }
 0x703   :  { %v1696_v51 = vpop.eup %1695 }
 0x704   :  { %326 = vrot.lane.b32.xlu0 %v1696_v51, %s1753_s13 }
 0x708   :  { %192 = vrot.lane.b32.xlu0 %v190_v10, %s1754_s14 }
 0x776   :  { %v327_v53 = vpop.permute.xlu0 %326 }
 0x777   :  { %v329_v54 = vmul.f32 %v327_v53, %v312_v38 }
 0x779   :  { %v330_v55 = vpack.c.bf16 %v329_v54, %v329_v54 }
 0x77a   :  { %v193_v56 = vpop.permute.xlu0 %192 }
 0x77b   :  { %332 = vrot.lane.b32.xlu0 %v330_v55, %s1754_s14  ;;  %1543 = vmatmul.mubr.msk.bf16.vlgmr.msra.gmra.mrb[4].mxu0 %vm74_vm1, %v193_v56 }
 0x77c   :  { %1555 = vmatpush3.bf16.msra.mxu0 %v1805_v13  ;;  %1558 = vmatprep.mubr.msk.bf16.mxu0 %vm1756_vm0, %v1755_v11 }
 0x77d   :  { %1556 = vmatprep.subr.bf16.mxu0 %v1755_v11 }
 0x780   :  { %1557 = vmatpush3.bf16.msra.mxu0 %v1822_v15 }
 0x781   :  { %1570 = vmatprep.subr.bf16.mxu0 %v1755_v11 }
 0x7ed   :  { %v333_v45 = vpop.permute.xlu0 %332 }
 0x7ee   :  { %1551 = vmatmul.mubr.msk.bf16.vlgmr.msra.gmra.mrb[4].mxu1 %vm74_vm1, %v333_v45  ;;  %1559 = vmatmul.mubr.msk.bf16.vlgmr.msra.gmra.mrb[8].mxu0 %vm74_vm1, %v333_v45 }
 0x7ef   :  { %1563 = vmatpush3.bf16.msra.mxu1 %v1915_v47  ;;  %1566 = vmatprep.mubr.msk.bf16.mxu1 %vm1756_vm0, %v1755_v11 }
 0x7f0   :  { %1564 = vmatprep.subr.bf16.mxu1 %v1755_v11  ;;  %1571 = vmatpush3.bf16.msra.mxu0 %v1800_v12 }
 0x7f1   :  { %1572 = vmatprep.subr.bf16.mxu0 %v1755_v11  ;;  %1574 = vmatprep.mubr.msk.bf16.mxu0 %vm1756_vm0, %v1755_v11 }
 0x7f3   :  { %1565 = vmatpush3.bf16.msra.mxu1 %v1923_v49 }
 0x7f4   :  { %1578 = vmatprep.subr.bf16.mxu1 %v1755_v11  ;;  %1573 = vmatpush3.bf16.msra.mxu0 %v1815_v14 }
 0x7f5   :  { %1586 = vmatprep.subr.bf16.mxu0 %v1755_v11 }
 0x84e   :  { %v243_v58 = vpop.f32.mrb[4].mxu0 }
 0x84f   :  { %v1544_v61 = vpop.f32.mrb[5].mxu0 }
 0x850   :  { %v246_v62 = vpop.f32.mrb[6].mxu0 }
 0x851   :  { %v1545_v63 = vpop.f32.mrb[7].mxu0 }
 0x8c1   :  { %v1956_v0 = vpop.f32.mrb[4].mxu1  ;;  %v411_v2 = vpop.f32.mrb[8].mxu0 }
 0x8c2   :  { %v412_v3 = vadd.f32 %v411_v2, %v243_v58  ;;  %v1552_v4 = vpop.f32.mrb[5].mxu1  ;;  %v1560_v6 = vpop.f32.mrb[9].mxu0 }
 0x8c3   :  { %v374_v7 = vpop.f32.mrb[6].mxu1  ;;  %v414_v8 = vpop.f32.mrb[10].mxu0 }
 0x8c4   :  { %v417_v9 = vadd.f32 %v412_v3, %v1844_v21  ;;  %v1553_v16 = vpop.f32.mrb[7].mxu1  ;;  %v1561_v17 = vpop.f32.mrb[11].mxu0 }
 0x8c6   :  { %1697 = vtanh.f32 %v417_v9 }
 0x8d0   :  { %v1698_v18 = vpop.eup %1697 }
 0x8d1   :  { %423 = vrot.lane.b32.xlu0 %v1698_v18, %s1753_s13  ;;  %v419_v19 = vadd.f32 1.0, %v1698_v18 }
 0x8d3   :  { %v420_v20 = vmul.f32 0.5, %v419_v19 }
 0x8d5   :  { %v421_v27 = vmul.f32 %v420_v20, %v1854_v39 }
 0x943   :  { %v424_v23 = vpop.permute.xlu0 %423 }
 0x944   :  { %v426_v24 = vmul.f32 %v424_v23, %v420_v20 }
 0x946   :  { %428 = vrot.lane.b32.xlu0 %v426_v24, %s1754_s14 }
 0x9b8   :  { %v429_v28 = vpop.permute.xlu0 %428 }
 0x9b9   :  { %v1962_v29 = vadd.f32 %v429_v28, %v421_v27 }
 0x9bb   :  { %1699 = vtanh.f32 %v1962_v29 }
 0x9c5   :  { %v1700_v30 = vpop.eup %1699 }
 0x9c6   :  { %434 = vrot.lane.b32.xlu1 %v1700_v30, %s1753_s13 }
 0x9ca   :  { %509 = vrot.lane.b32.xlu1 %v1885_v59, %s1760_s0 }
 0xa38   :  { %v435_v31 = vpop.permute.xlu1 %434 }
 0xa39   :  { %v437_v32 = vmul.f32 %v435_v31, %v420_v20 }
 0xa3b   :  { %v488_v33 = vrot.slane %v437_v32, %v1862_v43 }
 0xa3c   :  { %v510_v44 = vpop.permute.xlu1 %509 }
 0xa3d   :  { %v489_v34 = vmul.f32 %v488_v33, %v1866_v46 }
 0xa3f   :  { %491 = vrot.lane.b32.xlu0 %v489_v34, %s1754_s14 }
 0xab1   :  { %v492_v39 = vpop.permute.xlu0 %491 }
 0xab2   :  { %v494_v35 = vsel %vm74_vm1, %v492_v39, 0.0 }
 0xab3   :  { %495 = vadd.xlane.f32.xlu0 %v494_v35 }
 0xb40   :  { %v496_v36 = vpop.xlane.xlu0 %495 }
 0xb41   :  { %v497_v37 = vadd.f32 %v496_v36, %v1876_v52 }
 0xb43   :  { %1701 = vtanh.f32 %v497_v37 }
 0xb4d   :  { %v1702_v38 = vpop.eup %1701 }
 0xb4e   :  { %v499_v40 = vmul.f32 2.5, %v1702_v38  ;;  %v438_v38 = vpack.c.bf16 %v437_v32, %v437_v32 }
 0xb50   :  { %v1973_v22 = vadd.f32 %v499_v40, %v1880_v57 }
 0xb52   :  { %v512_v48 = vadd.f32 %v510_v44, %v1973_v22 }
 0xb54   :  { %v513_v51 = vsel %vm277_vm3, %v512_v48, -inf }
 0xb55   :  { %v514_v10 = vrot.slane %v513_v51, 4 }
 0xb57   :  { %v515_v53 = vmax.f32 %v513_v51, %v514_v10 }
 0xb59   :  { %v516_v54 = vrot.slane %v515_v53, 2 }
 0xb5b   :  { %v517_v55 = vmax.f32 %v515_v53, %v516_v54 }
 0xb5d   :  { %v518_v56 = vrot.slane %v517_v55, 1 }
 0xb5f   :  { %v519_v45 = vmax.f32 %v517_v55, %v518_v56 }
 0xb61   :  { %vm520_vm6 = vcmp.ge.f32.partialorder %v512_v48, %v519_v45 }
 0xb62   :  { %v521_v58 = vsel %vm520_vm6, %v1894_v5, 1e+09 }
 0xb63   :  { %v522_v61 = vsel %vm277_vm3, %v521_v58, inf }
 0xb64   :  { %v523_v62 = vrot.slane %v522_v61, 4 }
 0xb66   :  { %v524_v63 = vmin.f32 %v522_v61, %v523_v62 }
 0xb68   :  { %v525_v2 = vrot.slane %v524_v63, 2 }
 0xb6a   :  { %v526_v3 = vmin.f32 %v524_v63, %v525_v2 }
 0xb6c   :  { %v527_v4 = vrot.slane %v526_v3, 1 }
 0xb6e   :  { %v528_v6 = vmin.f32 %v526_v3, %v527_v4 }
 0xb70   :  { %v1652_v7 = vtrunc.f32 %v528_v6 }
 0xb72   :  { %v1653_v8 = vcvt.f32.s32 %v1652_v7 }
 0xb74   :  { %531 = vperm.xlu1 %1676, %v1653_v8  }
 0xbf3   :  { %v1979_v9 = vpop.permute.xlu1 %531 }
 0xbf4   :  { %vm534_vm7 = vcmp.eq.s32.totalorder %v1859_v42, %v1979_v9 }
 0xbf5   :  { %v535_v16 = vsel %vm534_vm7, %v1901_v25, 0.0 }
 0xbf6   :  { %v536_v17 = vrot.slane %v535_v16, 4 }
 0xbf8   :  { %v537_v18 = vadd.f32 %v536_v17, %v535_v16 }
 0xbfa   :  { %v538_v19 = vrot.slane %v537_v18, 2 }
 0xbfc   :  { %v539_v20 = vadd.f32 %v538_v19, %v537_v18 }
 0xbfe   :  { %v540_v23 = vrot.slane %v539_v20, 1 }
 0xc00   :  { %v541_v24 = vadd.f32 %v540_v23, %v539_v20 }
 0xc02   :  { %v542_v27 = vadd.f32 %v541_v24, %v1956_v0 }
 0xc04   :  { %v543_v28 = vadd.f32 %v542_v27, %v1787_v1 }
 0xc06   :  { %1703 = vtanh.f32 %v543_v28 }
 0xc10   :  { %v1704_v30 = vpop.eup %1703 }
 0xc11   :  { %549 = vrot.lane.b32.xlu1 %v1704_v30, %s1753_s13  ;;  %v545_v31 = vadd.f32 1.0, %v1704_v30 }
 0xc13   :  { %v546_v33 = vmul.f32 0.5, %v545_v31 }
 0xc15   :  { %v547_v35 = vmul.f32 %v546_v33, %v1925_v50 }
 0xc83   :  { %v550_v34 = vpop.permute.xlu1 %549 }
 0xc84   :  { %v552_v39 = vmul.f32 %v550_v34, %v546_v33 }
 0xc86   :  { %554 = vrot.lane.b32.xlu1 %v552_v39, %s1754_s14 }
 0xcf8   :  { %v555_v36 = vpop.permute.xlu1 %554 }
 0xcf9   :  { %v1989_v37 = vadd.f32 %v555_v36, %v547_v35 }
 0xcfb   :  { %1705 = vtanh.f32 %v1989_v37 }
 0xd05   :  { %v1706_v0 = vpop.eup %1705 }
 0xd06   :  { %560 = vrot.lane.b32.xlu1 %v1706_v0, %s1753_s13 }
 0xd0a   :  { %440 = vrot.lane.b32.xlu1 %v438_v38, %s1754_s14 }
 0xd78   :  { %v561_v40 = vpop.permute.xlu1 %560 }
 0xd79   :  { %v563_v44 = vmul.f32 %v561_v40, %v546_v33 }
 0xd7b   :  { %v564_v48 = vpack.c.bf16 %v563_v44, %v563_v44 }
 0xd7c   :  { %v441_v51 = vpop.permute.xlu1 %440 }
 0xd7d   :  { %566 = vrot.lane.b32.xlu0 %v564_v48, %s1754_s14  ;;  %1567 = vmatmul.mubr.msk.bf16.vlgmr.msra.gmra.mrb[8].mxu1 %vm74_vm1, %v441_v51 }
 0xd7e   :  { %1579 = vmatpush3.bf16.msra.mxu1 %v1805_v13  ;;  %1582 = vmatprep.mubr.msk.bf16.mxu1 %vm1756_vm0, %v1755_v11 }
 0xd7f   :  { %1580 = vmatprep.subr.bf16.mxu1 %v1755_v11 }
 0xd81   :  { %742 = vrot.lane.b32.xlu0 %v1885_v59, %s1761_s10 }
 0xd82   :  { %1581 = vmatpush3.bf16.msra.mxu1 %v1822_v15 }
 0xd83   :  { %1594 = vmatprep.subr.bf16.mxu1 %v1755_v11 }
 0xdef   :  { %v567_v50 = vpop.permute.xlu0 %566 }
 0xdf0   :  { %1575 = vmatmul.mubr.msk.bf16.vlgmr.msra.gmra.mrb[12].mxu0 %vm74_vm1, %v567_v50  ;;  %1583 = vmatmul.mubr.msk.bf16.vlgmr.msra.gmra.mrb[12].mxu1 %vm74_vm1, %v567_v50 }
 0xdf1   :  { %1587 = vmatpush3.bf16.msra.mxu0 %v1915_v47  ;;  %1590 = vmatprep.mubr.msk.bf16.mxu0 %vm1756_vm0, %v1755_v11 }
 0xdf2   :  { %1588 = vmatprep.subr.bf16.mxu0 %v1755_v11  ;;  %1595 = vmatpush3.bf16.msra.mxu1 %v1800_v12 }
 0xdf3   :  { %1596 = vmatprep.subr.bf16.mxu1 %v1755_v11  ;;  %1598 = vmatprep.mubr.msk.bf16.mxu1 %vm1756_vm0, %v1755_v11  ;;  %v743_v36 = vpop.permute.xlu0 %742 }
 0xdf5   :  { %1589 = vmatpush3.bf16.msra.mxu0 %v1923_v49 }
 0xdf6   :  { %1602 = vmatprep.subr.bf16.mxu0 %v1755_v11  ;;  %1597 = vmatpush3.bf16.msra.mxu1 %v1815_v14 }
 0xdf7   :  { %1610 = vmatprep.subr.bf16.mxu1 %v1755_v11 }
 0xe50   :  { %v479_v32 = vpop.f32.mrb[8].mxu1 }
 0xe51   :  { %v1568_v10 = vpop.f32.mrb[9].mxu1 }
 0xe52   :  { %v482_v53 = vpop.f32.mrb[10].mxu1 }
 0xe53   :  { %v1569_v54 = vpop.f32.mrb[11].mxu1 }
 0xec3   :  { %v2016_v55 = vpop.f32.mrb[12].mxu0  ;;  %v645_v56 = vpop.f32.mrb[12].mxu1 }
 0xec4   :  { %v646_v45 = vadd.f32 %v645_v56, %v479_v32  ;;  %v1576_v58 = vpop.f32.mrb[13].mxu0  ;;  %v1584_v61 = vpop.f32.mrb[13].mxu1 }
 0xec5   :  { %v608_v62 = vpop.f32.mrb[14].mxu0  ;;  %v648_v63 = vpop.f32.mrb[14].mxu1 }
 0xec6   :  { %v651_v2 = vadd.f32 %v646_v45, %v1844_v21  ;;  %v1577_v3 = vpop.f32.mrb[15].mxu0  ;;  %v1585_v4 = vpop.f32.mrb[15].mxu1 }
 0xec8   :  { %1707 = vtanh.f32 %v651_v2 }
 0xed2   :  { %v1708_v6 = vpop.eup %1707 }
 0xed3   :  { %657 = vrot.lane.b32.xlu1 %v1708_v6, %s1753_s13  ;;  %v653_v7 = vadd.f32 1.0, %v1708_v6 }
 0xed5   :  { %v654_v8 = vmul.f32 0.5, %v653_v7 }
 0xed7   :  { %v655_v18 = vmul.f32 %v654_v8, %v1962_v29 }
 0xf45   :  { %v658_v16 = vpop.permute.xlu1 %657 }
 0xf46   :  { %v660_v17 = vmul.f32 %v658_v16, %v654_v8 }
 0xf48   :  { %662 = vrot.lane.b32.xlu1 %v660_v17, %s1754_s14 }
 0xfba   :  { %v663_v19 = vpop.permute.xlu1 %662 }
 0xfbb   :  { %v2022_v20 = vadd.f32 %v663_v19, %v655_v18 }
 0xfbd   :  { %1709 = vtanh.f32 %v2022_v20 }
 0xfc7   :  { %v1710_v23 = vpop.eup %1709 }
 0xfc8   :  { %668 = vrot.lane.b32.xlu1 %v1710_v23, %s1753_s13 }
0x103a   :  { %v669_v24 = vpop.permute.xlu1 %668 }
0x103b   :  { %v671_v27 = vmul.f32 %v669_v24, %v654_v8 }
0x103d   :  { %v722_v28 = vrot.slane %v671_v27, %v1862_v43 }
0x103f   :  { %v723_v30 = vmul.f32 %v722_v28, %v1866_v46 }
0x1041   :  { %725 = vrot.lane.b32.xlu1 %v723_v30, %s1754_s14 }
0x10b3   :  { %v726_v29 = vpop.permute.xlu1 %725 }
0x10b4   :  { %v728_v31 = vsel %vm74_vm1, %v726_v29, 0.0 }
0x10b5   :  { %729 = vadd.xlane.f32.xlu1 %v728_v31 }
0x1142   :  { %v730_v33 = vpop.xlane.xlu1 %729 }
0x1143   :  { %v731_v34 = vadd.f32 %v730_v33, %v1876_v52 }
0x1145   :  { %1711 = vtanh.f32 %v731_v34 }
0x114f   :  { %v1712_v39 = vpop.eup %1711 }
0x1150   :  { %v733_v35 = vmul.f32 2.5, %v1712_v39 }
0x1152   :  { %v2033_v0 = vadd.f32 %v733_v35, %v1880_v57 }
0x1154   :  { %v745_v38 = vadd.f32 %v743_v36, %v2033_v0  ;;  %v672_v36 = vpack.c.bf16 %v671_v27, %v671_v27 }
0x1156   :  { %v746_v40 = vsel %vm277_vm3, %v745_v38, -inf }
0x1157   :  { %v747_v44 = vrot.slane %v746_v40, 4 }
0x1159   :  { %v748_v48 = vmax.f32 %v746_v40, %v747_v44 }
0x115b   :  { %v749_v51 = vrot.slane %v748_v48, 2 }
0x115d   :  { %v750_v50 = vmax.f32 %v748_v48, %v749_v51 }
0x115f   :  { %v751_v32 = vrot.slane %v750_v50, 1 }
0x1161   :  { %v752_v10 = vmax.f32 %v750_v50, %v751_v32 }
0x1163   :  { %vm753_vm8 = vcmp.ge.f32.partialorder %v745_v38, %v752_v10 }
0x1164   :  { %v754_v53 = vsel %vm753_vm8, %v1894_v5, 1e+09  ;;  %vm1435_vm8 = vcmask 65600  }
0x1165   :  { %v755_v54 = vsel %vm277_vm3, %v754_v53, inf }
0x1166   :  { %v756_v56 = vrot.slane %v755_v54, 4 }
0x1168   :  { %v757_v45 = vmin.f32 %v755_v54, %v756_v56 }
0x116a   :  { %v758_v58 = vrot.slane %v757_v45, 2 }
0x116c   :  { %v759_v61 = vmin.f32 %v757_v45, %v758_v58 }
0x116e   :  { %v760_v62 = vrot.slane %v759_v61, 1 }
0x1170   :  { %v761_v63 = vmin.f32 %v759_v61, %v760_v62 }
0x1172   :  { %v1654_v2 = vtrunc.f32 %v761_v63 }
0x1174   :  { %v1655_v3 = vcvt.f32.s32 %v1654_v2 }
0x1176   :  { %764 = vperm.xlu0 %1675, %v1655_v3  }
0x11f5   :  { %v2039_v4 = vpop.permute.xlu0 %764 }
0x11f6   :  { %vm767_vm9 = vcmp.eq.s32.totalorder %v1859_v42, %v2039_v4 }
0x11f7   :  { %v768_v6 = vsel %vm767_vm9, %v1901_v25, 0.0  ;;  %vm1437_vm9 = vcmask 73800  }
0x11f8   :  { %v769_v7 = vrot.slane %v768_v6, 4 }
0x11fa   :  { %v770_v8 = vadd.f32 %v769_v7, %v768_v6 }
0x11fc   :  { %v771_v16 = vrot.slane %v770_v8, 2 }
0x11fe   :  { %v772_v17 = vadd.f32 %v771_v16, %v770_v8 }
0x1200   :  { %v773_v18 = vrot.slane %v772_v17, 1 }
0x1202   :  { %v774_v19 = vadd.f32 %v773_v18, %v772_v17 }
0x1204   :  { %v775_v23 = vadd.f32 %v774_v19, %v2016_v55 }
0x1206   :  { %v776_v24 = vadd.f32 %v775_v23, %v1787_v1 }
0x1208   :  { %1713 = vtanh.f32 %v776_v24 }
0x1212   :  { %v1714_v28 = vpop.eup %1713 }
0x1213   :  { %782 = vrot.lane.b32.xlu0 %v1714_v28, %s1753_s13  ;;  %v778_v30 = vadd.f32 1.0, %v1714_v28 }
0x1215   :  { %v779_v29 = vmul.f32 0.5, %v778_v30 }
0x1217   :  { %v780_v34 = vmul.f32 %v779_v29, %v1989_v37 }
0x1285   :  { %v783_v31 = vpop.permute.xlu0 %782 }
0x1286   :  { %v785_v33 = vmul.f32 %v783_v31, %v779_v29 }
0x1288   :  { %787 = vrot.lane.b32.xlu0 %v785_v33, %s1754_s14 }
0x12fa   :  { %v788_v39 = vpop.permute.xlu0 %787 }
0x12fb   :  { %v2049_v35 = vadd.f32 %v788_v39, %v780_v34 }
0x12fd   :  { %1715 = vtanh.f32 %v2049_v35 }
0x1307   :  { %v1716_v55 = vpop.eup %1715 }
0x1308   :  { %793 = vrot.lane.b32.xlu0 %v1716_v55, %s1753_s13 }
0x130c   :  { %674 = vrot.lane.b32.xlu0 %v672_v36, %s1754_s14 }
0x137a   :  { %v794_v38 = vpop.permute.xlu0 %793 }
0x137b   :  { %v796_v40 = vmul.f32 %v794_v38, %v779_v29 }
0x137d   :  { %v797_v44 = vpack.c.bf16 %v796_v40, %v796_v40 }
0x137e   :  { %v675_v48 = vpop.permute.xlu0 %674 }
0x137f   :  { %799 = vrot.lane.b32.xlu0 %v797_v44, %s1754_s14  ;;  %1591 = vmatmul.mubr.msk.bf16.vlgmr.msra.gmra.mrb[16].mxu0 %vm74_vm1, %v675_v48 }
0x1380   :  { %1603 = vmatpush3.bf16.msra.mxu0 %v1805_v13  ;;  %1606 = vmatprep.mubr.msk.bf16.mxu0 %vm1756_vm0, %v1755_v11 }
0x1381   :  { %1604 = vmatprep.subr.bf16.mxu0 %v1755_v11 }
0x1384   :  { %1605 = vmatpush3.bf16.msra.mxu0 %v1822_v15 }
0x1385   :  { %1618 = vmatprep.subr.bf16.mxu0 %v1755_v11 }
0x13f1   :  { %v800_v37 = vpop.permute.xlu0 %799 }
0x13f2   :  { %1599 = vmatmul.mubr.msk.bf16.vlgmr.msra.gmra.mrb[16].mxu1 %vm74_vm1, %v800_v37  ;;  %1607 = vmatmul.mubr.msk.bf16.vlgmr.msra.gmra.mrb[20].mxu0 %vm74_vm1, %v800_v37 }
0x13f3   :  { %1611 = vmatpush3.bf16.msra.mxu1 %v1915_v47  ;;  %1614 = vmatprep.mubr.msk.bf16.mxu1 %vm1756_vm0, %v1755_v11 }
0x13f4   :  { %1612 = vmatprep.subr.bf16.mxu1 %v1755_v11  ;;  %1619 = vmatpush3.bf16.msra.mxu0 %v1800_v12 }
0x13f5   :  { %1620 = vmatprep.subr.bf16.mxu0 %v1755_v11  ;;  %1622 = vmatprep.mubr.msk.bf16.mxu0 %vm1756_vm0, %v1755_v11 }
0x13f7   :  { %1613 = vmatpush3.bf16.msra.mxu1 %v1923_v49 }
0x13f8   :  { %1626 = vmatprep.subr.bf16.mxu1 %v1755_v11  ;;  %1621 = vmatpush3.bf16.msra.mxu0 %v1815_v14 }
0x13f9   :  { %1634 = vmatprep.subr.bf16.mxu0 %v1755_v11 }
0x1452   :  { %v713_v27 = vpop.f32.mrb[16].mxu0 }
0x1453   :  { %v1592_v51 = vpop.f32.mrb[17].mxu0 }
0x1454   :  { %v716_v50 = vpop.f32.mrb[18].mxu0 }
0x1455   :  { %v1593_v32 = vpop.f32.mrb[19].mxu0 }
0x14c5   :  { %v2076_v10 = vpop.f32.mrb[16].mxu1  ;;  %v878_v12 = vpop.f32.mrb[20].mxu0 }
0x14c6   :  { %v879_v53 = vadd.f32 %v878_v12, %v713_v27  ;;  %v1600_v54 = vpop.f32.mrb[17].mxu1  ;;  %v1608_v56 = vpop.f32.mrb[21].mxu0 }
0x14c7   :  { %v841_v45 = vpop.f32.mrb[18].mxu1  ;;  %v881_v58 = vpop.f32.mrb[22].mxu0 }
0x14c8   :  { %v884_v61 = vadd.f32 %v879_v53, %v1844_v21  ;;  %v1601_v62 = vpop.f32.mrb[19].mxu1  ;;  %v1609_v63 = vpop.f32.mrb[23].mxu0 }
0x14ca   :  { %1717 = vtanh.f32 %v884_v61 }
0x14d4   :  { %v1718_v14 = vpop.eup %1717 }
0x14d5   :  { %890 = vrot.lane.b32.xlu0 %v1718_v14, %s1753_s13  ;;  %v886_v2 = vadd.f32 1.0, %v1718_v14 }
0x14d7   :  { %v887_v3 = vmul.f32 0.5, %v886_v2 }
0x14d9   :  { %v888_v8 = vmul.f32 %v887_v3, %v2022_v20 }
0x1547   :  { %v891_v6 = vpop.permute.xlu0 %890 }
0x1548   :  { %v893_v7 = vmul.f32 %v891_v6, %v887_v3 }
0x154a   :  { %895 = vrot.lane.b32.xlu0 %v893_v7, %s1754_s14 }
0x15bc   :  { %v896_v16 = vpop.permute.xlu0 %895 }
0x15bd   :  { %v2082_v17 = vadd.f32 %v896_v16, %v888_v8 }
0x15bf   :  { %1719 = vtanh.f32 %v2082_v17 }
0x15c9   :  { %v1720_v18 = vpop.eup %1719 }
0x15ca   :  { %901 = vrot.lane.b32.xlu1 %v1720_v18, %s1753_s13 }
0x15ce   :  { %975 = vrot.lane.b32.xlu1 %v1885_v59, %s1762_s11 }
0x163c   :  { %v902_v19 = vpop.permute.xlu1 %901 }
0x163d   :  { %v904_v23 = vmul.f32 %v902_v19, %v887_v3 }
0x163f   :  { %v955_v24 = vrot.slane %v904_v23, %v1862_v43 }
0x1640   :  { %v976_v39 = vpop.permute.xlu1 %975 }
0x1641   :  { %v956_v28 = vmul.f32 %v955_v24, %v1866_v46 }
0x1643   :  { %958 = vrot.lane.b32.xlu0 %v956_v28, %s1754_s14 }
0x16b5   :  { %v959_v20 = vpop.permute.xlu0 %958 }
0x16b6   :  { %v961_v30 = vsel %vm74_vm1, %v959_v20, 0.0 }
0x16b7   :  { %962 = vadd.xlane.f32.xlu0 %v961_v30 }
0x1744   :  { %v963_v29 = vpop.xlane.xlu0 %962 }
0x1745   :  { %v964_v31 = vadd.f32 %v963_v29, %v1876_v52 }
0x1747   :  { %1721 = vtanh.f32 %v964_v31 }
0x1751   :  { %v1722_v33 = vpop.eup %1721 }
0x1752   :  { %v966_v34 = vmul.f32 2.5, %v1722_v33 }
0x1754   :  { %v2093_v55 = vadd.f32 %v966_v34, %v1880_v57 }
0x1756   :  { %v978_v36 = vadd.f32 %v976_v39, %v2093_v55 }
0x1758   :  { %v979_v38 = vsel %vm277_vm3, %v978_v36, -inf }
0x1759   :  { %v980_v40 = vrot.slane %v979_v38, 4 }
0x175b   :  { %v981_v44 = vmax.f32 %v979_v38, %v980_v40 }
0x175d   :  { %v982_v48 = vrot.slane %v981_v44, 2 }
0x175f   :  { %v983_v37 = vmax.f32 %v981_v44, %v982_v48 }
0x1761   :  { %v984_v27 = vrot.slane %v983_v37, 1 }
0x1763   :  { %v985_v51 = vmax.f32 %v983_v37, %v984_v27 }
0x1765   :  { %vm986_vm10 = vcmp.ge.f32.partialorder %v978_v36, %v985_v51 }
0x1766   :  { %v987_v50 = vsel %vm986_vm10, %v1894_v5, 1e+09  ;;  %vm1444_vm10 = vcmask 122944  }
0x1767   :  { %v988_v32 = vsel %vm277_vm3, %v987_v50, inf }
0x1768   :  { %v989_v12 = vrot.slane %v988_v32, 4 }
0x176a   :  { %v990_v53 = vmin.f32 %v988_v32, %v989_v12 }
0x176c   :  { %v991_v54 = vrot.slane %v990_v53, 2 }
0x176e   :  { %v992_v56 = vmin.f32 %v990_v53, %v991_v54 }
0x1770   :  { %v993_v45 = vrot.slane %v992_v56, 1 }
0x1772   :  { %v994_v58 = vmin.f32 %v992_v56, %v993_v45 }
0x1774   :  { %v1656_v61 = vtrunc.f32 %v994_v58 }
0x1776   :  { %v1657_v62 = vcvt.f32.s32 %v1656_v61 }
0x1778   :  { %997 = vperm.xlu1 %1676, %v1657_v62  }
0x17f7   :  { %v2099_v63 = vpop.permute.xlu1 %997 }
0x17f8   :  { %vm1000_vm11 = vcmp.eq.s32.totalorder %v1859_v42, %v2099_v63 }
0x17f9   :  { %v1001_v14 = vsel %vm1000_vm11, %v1901_v25, 0.0 }
0x17fa   :  { %v1002_v2 = vrot.slane %v1001_v14, 4 }
0x17fc   :  { %v1003_v3 = vadd.f32 %v1002_v2, %v1001_v14 }
0x17fe   :  { %v1004_v6 = vrot.slane %v1003_v3, 2 }
0x1800   :  { %v1005_v7 = vadd.f32 %v1004_v6, %v1003_v3 }
0x1802   :  { %v1006_v8 = vrot.slane %v1005_v7, 1 }
0x1804   :  { %v1007_v16 = vadd.f32 %v1006_v8, %v1005_v7 }
0x1806   :  { %v1008_v18 = vadd.f32 %v1007_v16, %v2076_v10 }
0x1808   :  { %v1009_v19 = vadd.f32 %v1008_v18, %v1787_v1  ;;  %v905_v1 = vpack.c.bf16 %v904_v23, %v904_v23 }
0x180a   :  { %1723 = vtanh.f32 %v1009_v19 }
0x1814   :  { %v1724_v24 = vpop.eup %1723 }
0x1815   :  { %1015 = vrot.lane.b32.xlu1 %v1724_v24, %s1753_s13  ;;  %v1011_v28 = vadd.f32 1.0, %v1724_v24 }
0x1817   :  { %v1012_v20 = vmul.f32 0.5, %v1011_v28 }
0x1819   :  { %v1013_v31 = vmul.f32 %v1012_v20, %v2049_v35 }
0x1887   :  { %v1016_v30 = vpop.permute.xlu1 %1015 }
0x1888   :  { %v1018_v29 = vmul.f32 %v1016_v30, %v1012_v20 }
0x188a   :  { %1020 = vrot.lane.b32.xlu1 %v1018_v29, %s1754_s14 }
0x18fc   :  { %v1021_v33 = vpop.permute.xlu1 %1020 }
0x18fd   :  { %v2109_v34 = vadd.f32 %v1021_v33, %v1013_v31 }
0x18ff   :  { %1725 = vtanh.f32 %v2109_v34 }
0x1909   :  { %v1726_v10 = vpop.eup %1725 }
0x190a   :  { %1026 = vrot.lane.b32.xlu1 %v1726_v10, %s1753_s13 }
0x190e   :  { %907 = vrot.lane.b32.xlu1 %v905_v1, %s1754_s14 }
0x197c   :  { %v1027_v39 = vpop.permute.xlu1 %1026 }
0x197d   :  { %v1029_v36 = vmul.f32 %v1027_v39, %v1012_v20 }
0x197f   :  { %v1030_v38 = vpack.c.bf16 %v1029_v36, %v1029_v36 }
0x1980   :  { %v908_v40 = vpop.permute.xlu1 %907 }
0x1981   :  { %1032 = vrot.lane.b32.xlu0 %v1030_v38, %s1754_s14  ;;  %1615 = vmatmul.mubr.msk.bf16.vlgmr.msra.gmra.mrb[20].mxu1 %vm74_vm1, %v908_v40 }
0x1982   :  { %1627 = vmatpush3.bf16.msra.mxu1 %v1805_v13  ;;  %1630 = vmatprep.mubr.msk.bf16.mxu1 %vm1756_vm0, %v1755_v11 }
0x1983   :  { %1628 = vmatprep.subr.bf16.mxu1 %v1755_v11 }
0x1985   :  { %1208 = vrot.lane.b32.xlu0 %v1885_v59, %s1763_s12 }
0x1986   :  { %1629 = vmatpush3.bf16.msra.mxu1 %v1822_v15 }
0x1987   :  { %1642 = vmatprep.subr.bf16.mxu1 %v1755_v11 }
0x19f3   :  { %v1033_v35 = vpop.permute.xlu0 %1032 }
0x19f4   :  { %1623 = vmatmul.mubr.msk.bf16.vlgmr.msra.gmra.mrb[24].mxu0 %vm74_vm1, %v1033_v35  ;;  %1631 = vmatmul.mubr.msk.bf16.vlgmr.msra.gmra.mrb[24].mxu1 %vm74_vm1, %v1033_v35 }
0x19f5   :  { %1635 = vmatpush3.bf16.msra.mxu0 %v1915_v47  ;;  %1638 = vmatprep.mubr.msk.bf16.mxu0 %vm1756_vm0, %v1755_v11 }
0x19f6   :  { %1636 = vmatprep.subr.bf16.mxu0 %v1755_v11  ;;  %1643 = vmatpush3.bf16.msra.mxu1 %v1805_v13 }
0x19f7   :  { %1644 = vmatprep.subr.bf16.mxu1 %v1755_v11  ;;  %1646 = vmatprep.mubr.msk.bf16.mxu1 %vm1756_vm0, %v1755_v11  ;;  %v1209_v20 = vpop.permute.xlu0 %1208 }
0x19f9   :  { %1637 = vmatpush3.bf16.msra.mxu0 %v1923_v49 }
0x19fa   :  { %1645 = vmatpush3.bf16.msra.mxu1 %v1822_v15 }
0x1a54   :  { %v946_v23 = vpop.f32.mrb[20].mxu1 }
0x1a55   :  { %v1616_v44 = vpop.f32.mrb[21].mxu1 }
0x1a56   :  { %v949_v48 = vpop.f32.mrb[22].mxu1 }
0x1a57   :  { %v1617_v47 = vpop.f32.mrb[23].mxu1 }
0x1ac7   :  { %v2134_v37 = vpop.f32.mrb[24].mxu0  ;;  %v1111_v27 = vpop.f32.mrb[24].mxu1 }
0x1ac8   :  { %v1112_v51 = vadd.f32 %v1111_v27, %v946_v23  ;;  %v1624_v50 = vpop.f32.mrb[25].mxu0  ;;  %v1632_v32 = vpop.f32.mrb[25].mxu1 }
0x1ac9   :  { %v1074_v13 = vpop.f32.mrb[26].mxu0  ;;  %v1114_v12 = vpop.f32.mrb[26].mxu1 }
0x1aca   :  { %v1117_v53 = vadd.f32 %v1112_v51, %v1844_v21  ;;  %v1625_v54 = vpop.f32.mrb[27].mxu0  ;;  %v1633_v56 = vpop.f32.mrb[27].mxu1 }
0x1acc   :  { %1727 = vtanh.f32 %v1117_v53 }
0x1ad6   :  { %v1728_v49 = vpop.eup %1727 }
0x1ad7   :  { %1123 = vrot.lane.b32.xlu1 %v1728_v49, %s1753_s13  ;;  %v1119_v15 = vadd.f32 1.0, %v1728_v49 }
0x1ad9   :  { %v1120_v45 = vmul.f32 0.5, %v1119_v15 }
0x1adb   :  { %v1121_v62 = vmul.f32 %v1120_v45, %v2082_v17 }
0x1b49   :  { %v1124_v58 = vpop.permute.xlu1 %1123 }
0x1b4a   :  { %v1126_v61 = vmul.f32 %v1124_v58, %v1120_v45 }
0x1b4c   :  { %1128 = vrot.lane.b32.xlu1 %v1126_v61, %s1754_s14 }
0x1bbe   :  { %v1129_v14 = vpop.permute.xlu1 %1128 }
0x1bbf   :  { %v2140_v2 = vadd.f32 %v1129_v14, %v1121_v62 }
0x1bc1   :  { %1729 = vtanh.f32 %v2140_v2 }
0x1bcb   :  { %v1730_v21 = vpop.eup %1729 }
0x1bcc   :  { %1134 = vrot.lane.b32.xlu1 %v1730_v21, %s1753_s13 }
0x1c3e   :  { %v1135_v3 = vpop.permute.xlu1 %1134 }
0x1c3f   :  { %v1137_v6 = vmul.f32 %v1135_v3, %v1120_v45  ;;  %v1749_v45 = vld [vmem:[%s2265_s1 + $0x21] sm:$0x1] }
0x1c41   :  { %v1188_v7 = vrot.slane %v1137_v6, %v1862_v43 }
0x1c43   :  { %v1189_v8 = vmul.f32 %v1188_v7, %v1866_v46 }
0x1c45   :  { %1191 = vrot.lane.b32.xlu1 %v1189_v8, %s1754_s14 }
0x1cb7   :  { %v1192_v17 = vpop.permute.xlu1 %1191 }
0x1cb8   :  { %v1194_v16 = vsel %vm74_vm1, %v1192_v17, 0.0  ;;  %v1138_v17 = vpack.c.bf16 %v1137_v6, %v1137_v6 }
0x1cb9   :  { %1195 = vadd.xlane.f32.xlu1 %v1194_v16 }
0x1d46   :  { %v1196_v18 = vpop.xlane.xlu1 %1195 }
0x1d47   :  { %v1197_v19 = vadd.f32 %v1196_v18, %v1876_v52 }
0x1d49   :  { %1731 = vtanh.f32 %v1197_v19 }
0x1d53   :  { %v1732_v24 = vpop.eup %1731 }
0x1d54   :  { %v1199_v28 = vmul.f32 2.5, %v1732_v24 }
0x1d56   :  { %v2151_v59 = vadd.f32 %v1199_v28, %v1880_v57 }
0x1d58   :  { %v1211_v30 = vadd.f32 %v1209_v20, %v2151_v59 }
0x1d5a   :  { %v1212_v29 = vsel %vm277_vm3, %v1211_v30, -inf }
0x1d5b   :  { %v1213_v31 = vrot.slane %v1212_v29, 4 }
0x1d5d   :  { %v1214_v33 = vmax.f32 %v1212_v29, %v1213_v31 }
0x1d5f   :  { %v1215_v10 = vrot.slane %v1214_v33, 2 }
0x1d61   :  { %v1216_v1 = vmax.f32 %v1214_v33, %v1215_v10 }
0x1d63   :  { %v1217_v39 = vrot.slane %v1216_v1, 1 }
0x1d65   :  { %v1218_v36 = vmax.f32 %v1216_v1, %v1217_v39  ;;  %v1750_v1 = vld [vmem:[%s2265_s1 + $0x22] sm:$0x1] }
0x1d67   :  { %vm1219_vm12 = vcmp.ge.f32.partialorder %v1211_v30, %v1218_v36 }
0x1d68   :  { %v1220_v52 = vsel %vm1219_vm12, %v1894_v5, 1e+09 }
0x1d69   :  { %v1221_v38 = vsel %vm277_vm3, %v1220_v52, inf }
0x1d6a   :  { %v1222_v40 = vrot.slane %v1221_v38, 4 }
0x1d6c   :  { %v1223_v35 = vmin.f32 %v1221_v38, %v1222_v40 }
0x1d6e   :  { %v1224_v23 = vrot.slane %v1223_v35, 2 }
0x1d70   :  { %v1225_v44 = vmin.f32 %v1223_v35, %v1224_v23 }
0x1d72   :  { %v1226_v48 = vrot.slane %v1225_v44, 1 }
0x1d74   :  { %v1227_v47 = vmin.f32 %v1225_v44, %v1226_v48 }
0x1d76   :  { %v1658_v27 = vtrunc.f32 %v1227_v47 }
0x1d78   :  { %v1659_v51 = vcvt.f32.s32 %v1658_v27 }
0x1d7a   :  { %1230 = vperm.xlu0 %1675, %v1659_v51   ;;  %v1751_v51 = vld [vmem:[%s2265_s1 + $0x10] sm:$0xff] }
0x1df9   :  { %v2157_v50 = vpop.permute.xlu0 %1230 }
0x1dfa   :  { %vm1233_vm13 = vcmp.eq.s32.totalorder %v1859_v42, %v2157_v50 }
0x1dfb   :  { %v1234_v32 = vsel %vm1233_vm13, %v1901_v25, 0.0 }
0x1dfc   :  { %v1235_v13 = vrot.slane %v1234_v32, 4 }
0x1dfe   :  { %v1236_v12 = vadd.f32 %v1235_v13, %v1234_v32 }
0x1e00   :  { %v1237_v53 = vrot.slane %v1236_v12, 2 }
0x1e02   :  { %v1238_v54 = vadd.f32 %v1237_v53, %v1236_v12 }
0x1e04   :  { %v1239_v56 = vrot.slane %v1238_v54, 1 }
0x1e06   :  { %v1240_v49 = vadd.f32 %v1239_v56, %v1238_v54 }
0x1e08   :  { %v1241_v15 = vadd.f32 %v1240_v49, %v2134_v37 }
0x1e0a   :  { %v1242_v58 = vadd.f32 %v1749_v45, %v1241_v15 }
0x1e0c   :  { %1733 = vtanh.f32 %v1242_v58 }
0x1e16   :  { %v1734_v61 = vpop.eup %1733 }
0x1e17   :  { %1248 = vrot.lane.b32.xlu0 %v1734_v61, %s1753_s13  ;;  %v1244_v62 = vadd.f32 1.0, %v1734_v61 }
0x1e19   :  { %v1245_v14 = vmul.f32 0.5, %v1244_v62 }
0x1e1b   :  { %v1246_v3 = vmul.f32 %v1245_v14, %v2109_v34 }
0x1e89   :  { %v1249_v25 = vpop.permute.xlu0 %1248 }
0x1e8a   :  { %v1251_v21 = vmul.f32 %v1249_v25, %v1245_v14 }
0x1e8c   :  { %1253 = vrot.lane.b32.xlu0 %v1251_v21, %s1754_s14 }
0x1efe   :  { %v1254_v7 = vpop.permute.xlu0 %1253 }
0x1eff   :  { %v1256_v8 = vadd.f32 %v1254_v7, %v1246_v3 }
0x1f01   :  { %1735 = vtanh.f32 %v1256_v8 }
0x1f0b   :  { %v1736_v37 = vpop.eup %1735 }
0x1f0c   :  { %1259 = vrot.lane.b32.xlu0 %v1736_v37, %s1753_s13 }
0x1f10   :  { %1140 = vrot.lane.b32.xlu0 %v1138_v17, %s1754_s14 }
0x1f7e   :  { %v1260_v16 = vpop.permute.xlu0 %1259 }
0x1f7f   :  { %v1262_v18 = vmul.f32 %v1260_v16, %v1245_v14 }
0x1f81   :  { %v1263_v19 = vpack.c.bf16 %v1262_v18, %v1262_v18 }
0x1f82   :  { %v1141_v24 = vpop.permute.xlu0 %1140 }
0x1f83   :  { %1265 = vrot.lane.b32.xlu0 %v1263_v19, %s1754_s14  ;;  %1639 = vmatmul.mubr.msk.bf16.vlgmr.msra.gmra.mrb[28].mxu0 %vm74_vm1, %v1141_v24 }
0x1ff5   :  { %v1266_v28 = vpop.permute.xlu0 %1265 }
0x1ff6   :  { %1647 = vmatmul.mubr.msk.bf16.vlgmr.msra.gmra.mrb[28].mxu1 %vm74_vm1, %v1266_v28 }
0x2056   :  { %v1179_v34 = vpop.f32.mrb[28].mxu0 }
0x2057   :  { %v1640_v20 = vpop.f32.mrb[29].mxu0 }
0x2058   :  { %v1182_v30 = vpop.f32.mrb[30].mxu0 }
0x2059   :  { %v1641_v29 = vpop.f32.mrb[31].mxu0 }
0x20c9   :  { %v1304_v31 = vpop.f32.mrb[28].mxu1 }
0x20ca   :  { %v1305_v33 = vadd.f32 %v1304_v31, %v1179_v34  ;;  %v1648_v6 = vpop.f32.mrb[29].mxu1 }
0x20cb   :  { %v1307_v10 = vpop.f32.mrb[30].mxu1 }
0x20cc   :  { %v1310_v39 = vadd.f32 %v1750_v1, %v1305_v33  ;;  %v1649_v36 = vpop.f32.mrb[31].mxu1 }
0x20ce   :  { %1737 = vtanh.f32 %v1310_v39 }
0x20d8   :  { %v1738_v52 = vpop.eup %1737 }
0x20d9   :  { %1316 = vrot.lane.b32.xlu0 %v1738_v52, %s1753_s13  ;;  %v1312_v38 = vadd.f32 1.0, %v1738_v52 }
0x20db   :  { %v1313_v40 = vmul.f32 0.5, %v1312_v38 }
0x20dd   :  { %v1314_v44 = vmul.f32 %v1313_v40, %v2140_v2 }
0x214b   :  { %v1317_v35 = vpop.permute.xlu0 %1316 }
0x214c   :  { %v1319_v23 = vmul.f32 %v1317_v35, %v1313_v40 }
0x214e   :  { %1321 = vrot.lane.b32.xlu0 %v1319_v23, %s1754_s14 }
0x21c0   :  { %v1322_v48 = vpop.permute.xlu0 %1321 }
0x21c1   :  { %v1324_v47 = vadd.f32 %v1322_v48, %v1314_v44 }
0x21c3   :  { %1739 = vtanh.f32 %v1324_v47 }
0x21cd   :  { %v1740_v27 = vpop.eup %1739 }
0x21ce   :  { %1327 = vrot.lane.b32.xlu1 %v1740_v27, %s1753_s13 }
0x21d2   :  { %1354 = vrot.lane.b32.xlu1 %v1751_v51, %s1764_s21 }
0x21d6   :  { %272 = vperm.xlu1 %1676, %v1888_v60  }
0x21da   :  { %504 = vperm.xlu1 %1676, %v1973_v22   ;;  %v1752_v22 = vld [vmem:[%s2265_s1 + $0x18] sm:$0xff] }
0x21de   :  { %738 = vperm.xlu1 %1676, %v2033_v0  }
0x21e2   :  { %971 = vperm.xlu1 %1676, %v2093_v55  }
0x21e6   :  { %1204 = vperm.xlu1 %1676, %v2151_v59  }
0x2240   :  { %v1328_v2 = vpop.permute.xlu1 %1327 }
0x2241   :  { %v1330_v32 = vmul.f32 %v1328_v2, %v1313_v40 }
0x2243   :  { %v1334_v13 = vrot.slane %v1330_v32, %v1862_v43 }
0x2244   :  { %v1355_v43 = vpop.permute.xlu1 %1354 }
0x2245   :  { %v1335_v12 = vmul.f32 %v1334_v13, %v1866_v46 }
0x2247   :  { %1337 = vrot.lane.b32.xlu0 %v1335_v12, %s1754_s14 }
0x2255   :  { %v273_v19 = vpop.permute.xlu1 %272 }
0x2259   :  { %v505_v24 = vpop.permute.xlu1 %504 }
0x225d   :  { %v739_v28 = vpop.permute.xlu1 %738 }
0x2261   :  { %v972_v34 = vpop.permute.xlu1 %971 }
0x2265   :  { %v1205_v29 = vpop.permute.xlu1 %1204 }
0x22b9   :  { %v1338_v53 = vpop.permute.xlu0 %1337 }
0x22ba   :  { %v1340_v54 = vsel %vm74_vm1, %v1338_v53, 0.0 }
0x22bb   :  { %1341 = vadd.xlane.f32.xlu0 %v1340_v54 }
0x2348   :  { %v1342_v60 = vpop.xlane.xlu0 %1341 }
0x2349   :  { %v1343_v0 = vadd.f32 %v1752_v22, %v1342_v60 }
0x234b   :  { %1741 = vtanh.f32 %v1343_v0 }
0x2355   :  { %v1742_v55 = vpop.eup %1741 }
0x2356   :  { %v1345_v59 = vmul.f32 2.5, %v1742_v55 }
0x2358   :  { %v1346_v56 = vadd.f32 %v1345_v59, %v1880_v57 }
0x235a   :  { %1350 = vperm.xlu0 %1675, %v1346_v56   ;;  %v1357_v46 = vadd.f32 %v1355_v43, %v1346_v56 }
0x235c   :  { %v1358_v49 = vsel %vm277_vm3, %v1357_v46, -inf }
0x235d   :  { %v1359_v15 = vrot.slane %v1358_v49, 4 }
0x235f   :  { %v1360_v45 = vmax.f32 %v1358_v49, %v1359_v15 }
0x2361   :  { %v1361_v58 = vrot.slane %v1360_v45, 2 }
0x2363   :  { %v1362_v61 = vmax.f32 %v1360_v45, %v1361_v58 }
0x2365   :  { %v1363_v62 = vrot.slane %v1362_v61, 1 }
0x2367   :  { %v1364_v14 = vmax.f32 %v1362_v61, %v1363_v62 }
0x2369   :  { %vm1365_vm14 = vcmp.ge.f32.partialorder %v1357_v46, %v1364_v14 }
0x236a   :  { %v1366_v25 = vsel %vm1365_vm14, %v1894_v5, 1e+09  ;;  %v2205_v5 = vand.u32 127, %v31_v41 }
0x236b   :  { %v1367_v21 = vsel %vm277_vm3, %v1366_v25, inf }
0x236c   :  { %v1368_v3 = vrot.slane %v1367_v21, 4  ;;  %vm269_vm15 = vcmp.eq.s32.totalorder %v2205_v5, 0  ;;  %vm501_vm0 = vcmp.eq.s32.totalorder %v2205_v5, 1  ;;  %vm735_vm1 = vcmp.eq.s32.totalorder %v2205_v5, 2 }
0x236d   :  { %v275_v20 = vsel %vm269_vm15, %v273_v19, 0.0  ;;  %vm968_vm2 = vcmp.eq.s32.totalorder %v2205_v5, 3  ;;  %vm1347_vm3 = vcmp.eq.s32.totalorder %v2205_v5, 5  ;;  %vm1201_vm4 = vcmp.eq.s32.totalorder %v2205_v5, 4 }
0x236e   :  { %v1369_v7 = vmin.f32 %v1367_v21, %v1368_v3  ;;  %v507_v30 = vsel %vm501_vm0, %v505_v24, %v275_v20  ;;  %v299_v53 = vsel %vm269_vm15, %v1903_v26, 0  ;;  %vm1405_vm7 = vcmp.lt.s32.totalorder %v2205_v5, 6 }
0x236f   :  { %v741_v31 = vsel %vm735_vm1, %v739_v28, %v507_v30  ;;  %v533_v54 = vsel %vm501_vm0, %v1979_v9, %v299_v53 }
0x2370   :  { %v1370_v8 = vrot.slane %v1369_v7, 2  ;;  %v974_v41 = vsel %vm968_vm2, %v972_v34, %v741_v31  ;;  %v766_v60 = vsel %vm735_vm1, %v2039_v4, %v533_v54 }
0x2371   :  { %v1207_v33 = vsel %vm1201_vm4, %v1205_v29, %v974_v41  ;;  %v999_v0 = vsel %vm968_vm2, %v2099_v63, %v766_v60 }
0x2372   :  { %v1371_v57 = vmin.f32 %v1369_v7, %v1370_v8  ;;  %v1232_v55 = vsel %vm1201_vm4, %v2157_v50, %v999_v0  ;;  %v1473_v8 = vsel %vm1405_vm7, 1.0, %v1755_v11 }
0x2374   :  { %v1372_v37 = vrot.slane %v1371_v57, 1 }
0x2376   :  { %v1373_v17 = vmin.f32 %v1371_v57, %v1372_v37 }
0x2378   :  { %v1660_v16 = vtrunc.f32 %v1373_v17 }
0x237a   :  { %v1661_v18 = vcvt.f32.s32 %v1660_v16 }
0x237c   :  { %1376 = vperm.xlu1 %1676, %v1661_v18  }
0x23d9   :  { %v1351_v6 = vpop.permute.xlu0 %1350 }
0x23da   :  { %v1353_v10 = vsel %vm1347_vm3, %v1351_v6, %v1207_v33 }
0x23db   :  { %v1380_v1 = vsel %vm1379_vm5, %v1353_v10, -inf }
0x23dc   :  { %v1381_v39 = vrot.slane %v1380_v1, 4 }
0x23de   :  { %v1382_v36 = vmax.f32 %v1380_v1, %v1381_v39 }
0x23e0   :  { %v1383_v52 = vrot.slane %v1382_v36, 2 }
0x23e2   :  { %v1384_v38 = vmax.f32 %v1382_v36, %v1383_v52 }
0x23e4   :  { %v1385_v40 = vrot.slane %v1384_v38, 1 }
0x23e6   :  { %v1386_v35 = vmax.f32 %v1384_v38, %v1385_v40 }
0x23e8   :  { %v1387_v23 = vsub.f32 %v1353_v10, %v1386_v35 }
0x23ea   :  { %v1388_v44 = vmul.f32 1.442695, %v1387_v23 }
0x23ec   :  { %1743 = vpow2.f32 %v1388_v44 }
0x23f6   :  { %v1744_v48 = vpop.eup %1743 }
0x23f7   :  { %v1390_v47 = vsel %vm1379_vm5, %v1744_v48, 0.0 }
0x23f8   :  { %v1391_v27 = vrot.slane %v1390_v47, 4 }
0x23fa   :  { %v1392_v51 = vadd.f32 %v1391_v27, %v1390_v47 }
0x23fb   :  { %v1377_v22 = vpop.permute.xlu1 %1376 }
0x23fc   :  { %v1393_v2 = vrot.slane %v1392_v51, 2  ;;  %v1378_v26 = vsel %vm1347_vm3, %v1377_v22, %v1232_v55 }
0x23fd   :  { %vm1402_vm6 = vcmp.eq.s32.totalorder %v1859_v42, %v1378_v26  ;;  %v1439_v24 = vcvt.s32.f32 %v1378_v26 }
0x23fe   :  { %v1394_v32 = vadd.f32 %v1393_v2, %v1392_v51  ;;  %v1472_v63 = vsel %vm1402_vm6, 1.0, %v1755_v11 }
0x2400   :  { %v1395_v13 = vrot.slane %v1394_v32, 1 }
0x2402   :  { %v1396_v12 = vadd.f32 %v1395_v13, %v1394_v32 }
0x2404   :  { %1745 = vrcp.f32 %v1396_v12 }
0x2405   :  { %1747 = vlog2.f32 %v1396_v12 }
0x240e   :  { %v1746_v59 = vpop.eup %1745 }
0x240f   :  { %v1748_v56 = vpop.eup %1747  ;;  %v1398_v43 = vmul.f32 %v1746_v59, %v1744_v48 }
0x2410   :  { %v1400_v9 = vmul.f32 0.6931472, %v1748_v56 }
0x2411   :  { %1434 = vst.msk [vmem:[%s2267_s2] sm:$0xff] %vm1379_vm5, %v1398_v43 }
0x2412   :  { %v1401_v4 = vsub.f32 %v1387_v23, %v1400_v9 }
0x2414   :  { %v1420_v46 = vmul.f32 %v1401_v4, %v1398_v43  ;;  %v1408_v49 = vmul.f32 %v1472_v63, %v1401_v4 }
0x2416   :  { %v1421_v50 = vsel %vm1379_vm5, %v1420_v46, 0.0  ;;  %v1409_v15 = vsel %vm1379_vm5, %v1408_v49, 0.0 }
0x2417   :  { %v1422_v45 = vrot.slane %v1421_v50, 4  ;;  %v1410_v58 = vrot.slane %v1409_v15, 4 }
0x2419   :  { %v1411_v61 = vadd.f32 %v1410_v58, %v1409_v15  ;;  %v1423_v62 = vadd.f32 %v1422_v45, %v1421_v50 }
0x241b   :  { %v1424_v14 = vrot.slane %v1423_v62, 2  ;;  %v1412_v42 = vrot.slane %v1411_v61, 2 }
0x241d   :  { %v1425_v25 = vadd.f32 %v1424_v14, %v1423_v62  ;;  %v1413_v21 = vadd.f32 %v1412_v42, %v1411_v61 }
0x241f   :  { %v1426_v3 = vrot.slane %v1425_v25, 1  ;;  %v1414_v7 = vrot.slane %v1413_v21, 1 }
0x2421   :  { %v1427_v57 = vadd.f32 %v1426_v3, %v1425_v25  ;;  %v1415_v37 = vadd.f32 %v1414_v7, %v1413_v21 }
0x2423   :  { %v1428_v17 = vmul.f32 %v1473_v8, %v1427_v57  ;;  %v1416_v16 = vmul.f32 %v1473_v8, %v1415_v37 }
0x2425   :  { %v1429_v18 = vsel %vm1379_vm5, %v1428_v17, 0.0  ;;  %v1417_v19 = vsel %vm1379_vm5, %v1416_v16, 0.0 }
0x2426   :  { %1430 = vadd.xlane.f32.xlu1 %v1429_v18  ;;  %1418 = vadd.xlane.f32.xlu0 %v1417_v19 }
0x2437   :  { %1441 = vrot.lane.b32.xlu1 %v1439_v24, %s1765_s25 }
0x24b3   :  { %v1419_v28 = vpop.xlane.xlu0 %1418  ;;  %v1431_v5 = vpop.xlane.xlu1 %1430 }
0x24b4   :  { %1436 = vst.msk [vmem:[%s2267_s2] sm:$0x1] %vm1435_vm8, %v1419_v28  ;;  %v1432_v11 = vsub.f32 0.0, %v1431_v5 }
0x24b6   :  { %1438 = vst.msk [vmem:[%s2267_s2] sm:$0x1] %vm1437_vm9, %v1432_v11 }
0x24b7   :  { %v1442_v34 = vpop.permute.xlu1 %1441 }
0x24b8   :  { %1445 = vst.msk [vmem:[%s2267_s2 + $0x1] sm:$0x1] %vm1444_vm10, %v1442_v34 }

</bundles_post_ra>
